<compile_context>
chip_gen: v7x
topology: tpu7x:2x2x1
jax: 0.10.0
libtpu: 0.0.40
codegen_flags: <defaults>
</compile_context>

<pallas_src>
import jax
import jax.numpy as jnp
from jax import lax
from jax.experimental import pallas as pl
from jax.experimental.pallas import tpu as pltpu


LATENT_DIM = 2048   # self.latent_dim in the PyTorch module
STEM_CH = 32        # scaled-down stem width (real ResNet stem is 64)
STEM_K = 256        # 4 (padded Cin) * 8 * 8 patch features, lane-aligned


def _round_up(x, m):
    return (x + m - 1) // m * m


def _pick_tile(m, cap):
    """Largest multiple of 8 <= cap that divides round_up(m, 8)."""
    mp = _round_up(m, 8)
    t = min(cap, mp)
    t -= t % 8
    while mp % t:
        t -= 8
    return t, mp


# ---------------------------------------------------------------------------
# Pallas kernels
# ---------------------------------------------------------------------------
def _stem_matmul_bias_relu_kernel(p_ref, w_ref, b_ref, o_ref):
    """(patches @ (w * bn_scale)) + bn_bias, then ReLU (bf16 out).

    The BN scale is folded into `w` in the wrapper, so the kernel is
    matmul + bias + ReLU only.
    """
    y = jnp.dot(p_ref[...], w_ref[...], preferred_element_type=jnp.float32)
    o_ref[...] = jnp.maximum(y + b_ref[...], 0.0).astype(o_ref.dtype)


def _head_matmul_bias_relu_sum_kernel(x_ref, w_ref, b_ref, o_ref, acc_ref):
    """1x1-conv matmul (BN scale pre-folded) + bias + ReLU + spatial sum.

    grid = (N, P, S); S is the "arbitrary" GAP-reduction axis.  The (ts, 2048)
    activation tile never leaves VMEM.  No per-step masking: padded spatial
    rows of x are exactly zero, their ReLU(bias) contribution is subtracted
    analytically in the wrapper.
    """
    s = pl.program_id(2)

    @pl.when(s == 0)
    def _():
        acc_ref[...] = jnp.zeros_like(acc_ref)

    y = jnp.dot(x_ref[0], w_ref[...], preferred_element_type=jnp.float32)
    y = jnp.maximum(y + b_ref[...], 0.0)                # f32 VPU math
    acc_ref[...] += jnp.sum(y, axis=0, keepdims=True)

    @pl.when(s == pl.num_programs(2) - 1)
    def _():
        o_ref[...] = acc_ref[...][None, None]           # (1, 1, 1, Cout)


# ---------------------------------------------------------------------------
# Wrappers around pallas_call
# ---------------------------------------------------------------------------
def stem_conv_bn_relu(patches, w, b, *, tm):
    """patches: (Mp, 256) bf16, w: (256, 32) bf16, b: (1, 32) f32 -> (Mp, 32) bf16."""
    M, K = patches.shape
    C = w.shape[1]
    assert M % tm == 0 and K % 128 == 0
    return pl.pallas_call(
        _stem_matmul_bias_relu_kernel,
        out_shape=jax.ShapeDtypeStruct((M, C), jnp.bfloat16),
        grid_spec=pltpu.PrefetchScalarGridSpec(
            num_scalar_prefetch=0,
            grid=(M // tm,),
            in_specs=[
                pl.BlockSpec((tm, K), lambda i: (i, 0)),
                pl.BlockSpec((K, C), lambda i: (0, 0)),
                pl.BlockSpec((1, C), lambda i: (0, 0)),
            ],
            out_specs=pl.BlockSpec((tm, C), lambda i: (i, 0)),
        ),
        compiler_params=pltpu.CompilerParams(
            dimension_semantics=("parallel",)),
    )(patches, w, b)


def head_conv_bn_relu_gap_partial(x_nlc, w, b, *, ts, n_part):
    """x: (N, HWp, Cin) bf16, w: (Cin, 2048) bf16, b: (1, 2048) f32.

    Returns (N, n_part, 1, 2048) f32 partial spatial sums of ReLU(x @ w + b).
    Full Cout (2048) per step -> x is streamed exactly once; the spatial
    "arbitrary" axis accumulates in a VMEM scratch.
    """
    N, HWp, Cin = x_nlc.shape
    Cout = w.shape[1]
    assert HWp % ts == 0
    n_st = HWp // ts
    assert n_st % n_part == 0
    s_per_part = n_st // n_part

    return pl.pallas_call(
        _head_matmul_bias_relu_sum_kernel,
        out_shape=jax.ShapeDtypeStruct((N, n_part, 1, Cout), jnp.float32),
        grid_spec=pltpu.PrefetchScalarGridSpec(
            num_scalar_prefetch=0,
            grid=(N, n_part, s_per_part),
            in_specs=[
                pl.BlockSpec((1, ts, Cin),
                             lambda n, p, s: (n, p * s_per_part + s, 0)),
                pl.BlockSpec((Cin, Cout), lambda n, p, s: (0, 0)),
                pl.BlockSpec((1, Cout), lambda n, p, s: (0, 0)),
            ],
            out_specs=pl.BlockSpec((1, 1, 1, Cout), lambda n, p, s: (n, p, 0, 0)),
            scratch_shapes=[pltpu.VMEM((1, Cout), jnp.float32)],
        ),
        compiler_params=pltpu.CompilerParams(
            dimension_semantics=("parallel", "parallel", "arbitrary")),
    )(x_nlc, w, b)


# ---------------------------------------------------------------------------
# Glue: BN folding, aligned bf16 patch extraction, maxpool (NHWC)
# ---------------------------------------------------------------------------
def fold_bn(gamma, beta, running_mean, running_var, eps=1e-5):
    """Fold inference-mode BatchNorm into a per-channel scale & bias (1-D, f32)."""
    scale = gamma / jnp.sqrt(running_var + eps)
    bias = beta - running_mean * scale
    return scale, bias


def stem_patches_bf16(x_nchw):
    """Single-pass, lane-aligned bf16 im2col for the 7x7/s2/pad3 stem conv.

    Input channels are padded 3->4 and 8x8 windows with padding (3,4) are
    extracted so K = 4*8*8 = 256.  The extra taps/channel meet zero weights,
    giving a result identical to the 7x7 conv, while only ONE bf16 patch array
    ever hits HBM (no later K-pad / dtype-cast copies).
    """
    x_bf = jnp.pad(x_nchw.astype(jnp.bfloat16), ((0, 0), (0, 1), (0, 0), (0, 0)))
    patches = lax.conv_general_dilated_patches(
        x_bf, filter_shape=(8, 8), window_strides=(2, 2),
        padding=((3, 4), (3, 4)),
        dimension_numbers=("NCHW", "OIHW", "NHWC"))          # (N, Ho, Wo, 256) bf16
    n, ho, wo, k = patches.shape
    assert k == STEM_K
    return patches.reshape(n * ho * wo, k), (ho, wo)         # free reshape


def maxpool_nhwc(x, k=3, stride=2, pad=1):
    return lax.reduce_window(
        x, jnp.array(-jnp.inf, x.dtype), lax.max,
        window_dimensions=(1, k, k, 1),
        window_strides=(1, stride, stride, 1),
        padding=((0, 0), (pad, pad), (pad, pad), (0, 0)))


# ---------------------------------------------------------------------------
# Parameters (deterministic, small-scale but structurally faithful)
# ---------------------------------------------------------------------------
def init_params(key):
    ks = jax.random.split(key, 8)
    p = {}
    # conv1: 7x7 / s2, 3 -> STEM_CH   (PyTorch weight layout (Cout, Cin, kh, kw))
    p["conv1_w"] = 0.05 * jax.random.normal(ks[0], (STEM_CH, 3, 7, 7), jnp.float32)
    p["bn1_gamma"] = jnp.ones((STEM_CH,), jnp.float32)
    p["bn1_beta"] = jnp.zeros((STEM_CH,), jnp.float32)
    p["bn1_mean"] = 0.1 * jax.random.normal(ks[1], (STEM_CH,), jnp.float32)
    p["bn1_var"] = 0.5 + jnp.abs(jax.random.normal(ks[2], (STEM_CH,), jnp.float32))
    # head: 1x1 conv, STEM_CH -> LATENT_DIM
    p["conv2_w"] = 0.05 * jax.random.normal(ks[3], (LATENT_DIM, STEM_CH, 1, 1), jnp.float32)
    p["bn2_gamma"] = 1.0 + 0.1 * jax.random.normal(ks[4], (LATENT_DIM,), jnp.float32)
    p["bn2_beta"] = 0.1 * jax.random.normal(ks[5], (LATENT_DIM,), jnp.float32)
    p["bn2_mean"] = 0.1 * jax.random.normal(ks[6], (LATENT_DIM,), jnp.float32)
    p["bn2_var"] = 0.5 + jnp.abs(jax.random.normal(ks[7], (LATENT_DIM,), jnp.float32))
    return p


# ---------------------------------------------------------------------------
# HInDexEncoderBN.forward (== model.extract_feature) at small scale
# ---------------------------------------------------------------------------
@jax.jit
def hindex_encoder_forward(x_nchw, params):
    N = x_nchw.shape[0]

    # Fold test-time BN into per-channel scale/bias; scale goes into the weights.
    s1, b1 = fold_bn(params["bn1_gamma"], params["bn1_beta"],
                     params["bn1_mean"], params["bn1_var"])
    s2, b2 = fold_bn(params["bn2_gamma"], params["bn2_beta"],
                     params["bn2_mean"], params["bn2_var"])

    # --- stem: conv 7x7/s2 + BN + ReLU (fused Pallas matmul) -----------------
    patches, (Ho, Wo) = stem_patches_bf16(x_nchw)            # (M1, 256) bf16
    M1 = patches.shape[0]
    tm, M1p = _pick_tile(M1, 2048)                           # big row tile, all gens
    if M1p != M1:
        patches = jnp.pad(patches, ((0, M1p - M1), (0, 0)))

    # weight (Cout, 3, 7, 7): fold BN scale, zero-pad to (Cout, 4, 8, 8), then
    # flatten to (K=256, Cout) matching the (c, kh, kw) patch-feature order.
    w1 = params["conv1_w"] * s1[:, None, None, None]
    w1 = jnp.pad(w1, ((0, 0), (0, 1), (0, 1), (0, 1)))
    w1 = w1.reshape(STEM_CH, STEM_K).T.astype(jnp.bfloat16)  # (256, 32)

    y1 = stem_conv_bn_relu(patches, w1, b1[None, :], tm=tm)  # (M1p, 32) bf16
    y1 = y1[:M1].reshape(N, Ho, Wo, STEM_CH)                 # NHWC, natural 32 ch

    # --- maxpool 3x3/s2 on NHWC (glue; 32-ch bf16 -> 4x less HBM than before) --
    y1 = maxpool_nhwc(y1, k=3, stride=2, pad=1)              # (N, Hp, Wp, 32)
    _, Hp, Wp, _ = y1.shape
    HW = Hp * Wp

    # --- head: 1x1 conv -> 2048 + BN + ReLU + GAP, fused in one kernel -------
    ts, HWp = _pick_tile(HW, 1024)
    flat = y1.reshape(N, HW, STEM_CH)
    if HWp != HW:
        flat = jnp.pad(flat, ((0, 0), (0, HWp - HW), (0, 0)))  # zero rows

    w2 = params["conv2_w"].reshape(LATENT_DIM, STEM_CH)
    w2 = (w2 * s2[:, None]).T.astype(jnp.bfloat16)           # (32, 2048)

    n_st = HWp // ts
    # >= 2 "parallel" grid slices for the 2-TensorCore v7x even at batch 1.
    n_part = 1 if N >= 2 else (2 if (n_st % 2 == 0 and n_st >= 2) else 1)

    psums = head_conv_bn_relu_gap_partial(flat, w2, b2[None, :],
                                          ts=ts, n_part=n_part)  # (N, P, 1, 2048) f32
    sums = jnp.sum(psums, axis=(1, 2))                           # (N, 2048) f32
    if HWp != HW:
        # Analytic pad correction: each zero-padded spatial row contributed
        # exactly ReLU(b2) to the sum (same f32 path as the kernel).
        sums = sums - (HWp - HW) * jnp.maximum(b2, 0.0)[None, :]
    return sums * (1.0 / HW)                                     # global average pool


# ---------------------------------------------------------------------------
if __name__ == "__main__":
    key = jax.random.PRNGKey(0)
    k_x, k_p = jax.random.split(key)

    # Small image batch, NCHW like the PyTorch module expects.
    x = jax.random.normal(k_x, (2, 3, 32, 32), jnp.float32)
    params = init_params(k_p)

    feats = hindex_encoder_forward(x, params)
    jax.block_until_ready(feats)

    assert feats.shape == (2, LATENT_DIM), feats.shape
    assert feats.dtype == jnp.float32
    assert bool(jnp.all(jnp.isfinite(feats)))
    print("KERNEL_OK")
</pallas_src>

<mosaic_0001>
module attributes {stable_mosaic.version = 11 : i64} {
  func.func @_stem_matmul_bias_relu_kernel(%arg0: i32, %arg1: memref<512x256xbf16, #tpu.memory_space<vmem>>, %arg2: memref<256x32xbf16, #tpu.memory_space<vmem>>, %arg3: memref<1x32xf32, #tpu.memory_space<vmem>>, %arg4: memref<512x32xbf16, #tpu.memory_space<vmem>>) attributes {dimension_semantics = [#tpu.dimension_semantics<parallel>], iteration_bounds = array<i64: 1>, scalar_prefetch = 0 : i64, scratch_operands = 0 : i64, tpu.core_type = #tpu.core_type<tc>, window_params = [{transform_indices = @transform_0, window_bounds = array<i64: 512, 256>}, {pipeline_mode = #tpu.pipeline_mode<synchronous>, transform_indices = @transform_1, window_bounds = array<i64: 256, 32>}, {pipeline_mode = #tpu.pipeline_mode<synchronous>, transform_indices = @transform_2, window_bounds = array<i64: 1, 32>}, {transform_indices = @transform_3, window_bounds = array<i64: 512, 32>}]} {
    %c0 = arith.constant 0 : index
    %c0_0 = arith.constant 0 : index
    %0 = vector.load %arg1[%c0, %c0_0] : memref<512x256xbf16, #tpu.memory_space<vmem>>, vector<512x256xbf16>
    %c0_1 = arith.constant 0 : index
    %c0_2 = arith.constant 0 : index
    %1 = vector.load %arg2[%c0_1, %c0_2] : memref<256x32xbf16, #tpu.memory_space<vmem>>, vector<256x32xbf16>
    %cst = arith.constant dense<0.000000e+00> : vector<512x32xf32>
    %2 = tpu.matmul %0, %1, %cst {dimension_numbers = #tpu.dot_dimension_numbers<[1], [0], [0], [1], [0, 0, 1, 1], [], []>} : vector<512x256xbf16>, vector<256x32xbf16>, vector<512x32xf32> -> vector<512x32xf32>
    %c0_3 = arith.constant 0 : index
    %c0_4 = arith.constant 0 : index
    %3 = vector.load %arg3[%c0_3, %c0_4] : memref<1x32xf32, #tpu.memory_space<vmem>>, vector<1x32xf32>
    %4 = vector.broadcast %3 : vector<1x32xf32> to vector<512x32xf32>
    %5 = arith.addf %2, %4 : vector<512x32xf32>
    %cst_5 = arith.constant 0.000000e+00 : f32
    %6 = vector.broadcast %cst_5 : f32 to vector<512x32xf32>
    %7 = arith.maximumf %5, %6 : vector<512x32xf32>
    %8 = arith.truncf %7 : vector<512x32xf32> to vector<512x32xbf16>
    %c0_6 = arith.constant 0 : index
    %c0_7 = arith.constant 0 : index
    %9 = vector.load %arg4[%c0_6, %c0_7] : memref<512x32xbf16, #tpu.memory_space<vmem>>, vector<512x32xbf16>
    tpu.vector_store %arg4[%c0_6, %c0_7], %8 {strides = array<i32>} : memref<512x32xbf16, #tpu.memory_space<vmem>>, vector<512x32xbf16>,
    return
  }
  func.func @transform_0(%arg0: i32) -> (i32, i32) {
    %c0_i32 = arith.constant 0 : i32
    %c0_i32_0 = arith.constant 0 : i32
    return %arg0, %c0_i32 : i32, i32
  }
  func.func @transform_1(%arg0: i32) -> (i32, i32) {
    %c0_i32 = arith.constant 0 : i32
    %c0_i32_0 = arith.constant 0 : i32
    %c0_i32_1 = arith.constant 0 : i32
    return %c0_i32, %c0_i32_0 : i32, i32
  }
  func.func @transform_2(%arg0: i32) -> (i32, i32) {
    %c0_i32 = arith.constant 0 : i32
    %c0_i32_0 = arith.constant 0 : i32
    %c0_i32_1 = arith.constant 0 : i32
    return %c0_i32, %c0_i32_0 : i32, i32
  }
  func.func @transform_3(%arg0: i32) -> (i32, i32) {
    %c0_i32 = arith.constant 0 : i32
    %c0_i32_0 = arith.constant 0 : i32
    return %arg0, %c0_i32 : i32, i32
  }
}

module attributes {stable_mosaic.version = 11 : i64} {
  func.func @_head_matmul_bias_relu_sum_kernel(%arg0: i32, %arg1: i32, %arg2: i32, %arg3: memref<1x64x32xbf16, #tpu.memory_space<vmem>>, %arg4: memref<32x2048xbf16, #tpu.memory_space<vmem>>, %arg5: memref<1x2048xf32, #tpu.memory_space<vmem>>, %arg6: memref<1x1x1x2048xf32, #tpu.memory_space<vmem>>, %arg7: memref<1x2048xf32, #tpu.memory_space<vmem>>) attributes {dimension_semantics = [#tpu.dimension_semantics<parallel>, #tpu.dimension_semantics<parallel>, #tpu.dimension_semantics<arbitrary>], iteration_bounds = array<i64: 2, 1, 1>, scalar_prefetch = 0 : i64, scratch_operands = 1 : i64, tpu.core_type = #tpu.core_type<tc>, window_params = [{transform_indices = @transform_0, window_bounds = array<i64: 1, 64, 32>}, {pipeline_mode = #tpu.pipeline_mode<synchronous>, transform_indices = @transform_1, window_bounds = array<i64: 32, 2048>}, {pipeline_mode = #tpu.pipeline_mode<synchronous>, transform_indices = @transform_2, window_bounds = array<i64: 1, 2048>}, {transform_indices = @transform_3, window_bounds = array<i64: 1, 1, 1, 2048>}]} {
    %c0_i32 = arith.constant 0 : i32
    %0 = arith.cmpi eq, %arg2, %c0_i32 : i32
    %1 = arith.extui %0 : i1 to i32
    %c0_i32_0 = arith.constant 0 : i32
    %2 = arith.cmpi ne, %1, %c0_i32_0 : i32
    scf.if %2 {
      %cst_15 = arith.constant 0.000000e+00 : f32
      %20 = vector.broadcast %cst_15 : f32 to vector<1x2048xf32>
      %c0_16 = arith.constant 0 : index
      %c0_17 = arith.constant 0 : index
      %21 = vector.load %arg7[%c0_16, %c0_17] : memref<1x2048xf32, #tpu.memory_space<vmem>>, vector<1x2048xf32>
      tpu.vector_store %arg7[%c0_16, %c0_17], %20 {strides = array<i32>} : memref<1x2048xf32, #tpu.memory_space<vmem>>, vector<1x2048xf32>,
    } else {
    }
    %c0 = arith.constant 0 : index
    %c0_1 = arith.constant 0 : index
    %c0_2 = arith.constant 0 : index
    %3 = vector.load %arg3[%c0, %c0_1, %c0_2] : memref<1x64x32xbf16, #tpu.memory_space<vmem>>, vector<1x64x32xbf16>
    %4 = vector.shape_cast %3 : vector<1x64x32xbf16> to vector<64x32xbf16>
    %c0_3 = arith.constant 0 : index
    %c0_4 = arith.constant 0 : index
    %5 = vector.load %arg4[%c0_3, %c0_4] : memref<32x2048xbf16, #tpu.memory_space<vmem>>, vector<32x2048xbf16>
    %cst = arith.constant dense<0.000000e+00> : vector<64x2048xf32>
    %6 = tpu.matmul %4, %5, %cst {dimension_numbers = #tpu.dot_dimension_numbers<[1], [0], [0], [1], [0, 0, 1, 1], [], []>} : vector<64x32xbf16>, vector<32x2048xbf16>, vector<64x2048xf32> -> vector<64x2048xf32>
    %c0_5 = arith.constant 0 : index
    %c0_6 = arith.constant 0 : index
    %7 = vector.load %arg5[%c0_5, %c0_6] : memref<1x2048xf32, #tpu.memory_space<vmem>>, vector<1x2048xf32>
    %8 = vector.broadcast %7 : vector<1x2048xf32> to vector<64x2048xf32>
    %9 = arith.addf %6, %8 : vector<64x2048xf32>
    %cst_7 = arith.constant 0.000000e+00 : f32
    %10 = vector.broadcast %cst_7 : f32 to vector<64x2048xf32>
    %11 = arith.maximumf %9, %10 : vector<64x2048xf32>
    %c0_8 = arith.constant 0 : index
    %c0_9 = arith.constant 0 : index
    %12 = vector.load %arg7[%c0_8, %c0_9] : memref<1x2048xf32, #tpu.memory_space<vmem>>, vector<1x2048xf32>
    %cst_10 = arith.constant dense<0.000000e+00> : vector<2048xf32>
    %13 = vector.multi_reduction <add>, %11, %cst_10 [0] : vector<64x2048xf32> to vector<2048xf32>
    %14 = vector.shape_cast %13 : vector<2048xf32> to vector<1x2048xf32>
    %15 = arith.addf %12, %14 : vector<1x2048xf32>
    %c0_11 = arith.constant 0 : index
    %c0_12 = arith.constant 0 : index
    %16 = vector.load %arg7[%c0_11, %c0_12] : memref<1x2048xf32, #tpu.memory_space<vmem>>, vector<1x2048xf32>
    tpu.vector_store %arg7[%c0_11, %c0_12], %15 {strides = array<i32>} : memref<1x2048xf32, #tpu.memory_space<vmem>>, vector<1x2048xf32>,
    %c0_i32_13 = arith.constant 0 : i32
    %17 = arith.cmpi eq, %arg2, %c0_i32_13 : i32
    %18 = arith.extui %17 : i1 to i32
    %c0_i32_14 = arith.constant 0 : i32
    %19 = arith.cmpi ne, %18, %c0_i32_14 : i32
    scf.if %19 {
      %c0_15 = arith.constant 0 : index
      %c0_16 = arith.constant 0 : index
      %20 = vector.load %arg7[%c0_15, %c0_16] : memref<1x2048xf32, #tpu.memory_space<vmem>>, vector<1x2048xf32>
      %21 = vector.shape_cast %20 : vector<1x2048xf32> to vector<1x1x1x2048xf32>
      %c0_17 = arith.constant 0 : index
      %c0_18 = arith.constant 0 : index
      %c0_19 = arith.constant 0 : index
      %c0_20 = arith.constant 0 : index
      %22 = vector.load %arg6[%c0_17, %c0_18, %c0_19, %c0_20] : memref<1x1x1x2048xf32, #tpu.memory_space<vmem>>, vector<1x1x1x2048xf32>
      tpu.vector_store %arg6[%c0_17, %c0_18, %c0_19, %c0_20], %21 {strides = array<i32>} : memref<1x1x1x2048xf32, #tpu.memory_space<vmem>>, vector<1x1x1x2048xf32>,
    } else {
    }
    return
  }
  func.func @transform_0(%arg0: i32, %arg1: i32, %arg2: i32) -> (i32, i32, i32) {
    %c1_i32 = arith.constant 1 : i32
    %0 = arith.muli %arg1, %c1_i32 : i32
    %1 = arith.addi %0, %arg2 : i32
    %c0_i32 = arith.constant 0 : i32
    %c0_i32_0 = arith.constant 0 : i32
    return %arg0, %1, %c0_i32 : i32, i32, i32
  }
  func.func @transform_1(%arg0: i32, %arg1: i32, %arg2: i32) -> (i32, i32) {
    %c0_i32 = arith.constant 0 : i32
    %c0_i32_0 = arith.constant 0 : i32
    %c0_i32_1 = arith.constant 0 : i32
    return %c0_i32, %c0_i32_0 : i32, i32
  }
  func.func @transform_2(%arg0: i32, %arg1: i32, %arg2: i32) -> (i32, i32) {
    %c0_i32 = arith.constant 0 : i32
    %c0_i32_0 = arith.constant 0 : i32
    %c0_i32_1 = arith.constant 0 : i32
    return %c0_i32, %c0_i32_0 : i32, i32
  }
  func.func @transform_3(%arg0: i32, %arg1: i32, %arg2: i32) -> (i32, i32, i32, i32) {
    %c0_i32 = arith.constant 0 : i32
    %c0_i32_0 = arith.constant 0 : i32
    %c0_i32_1 = arith.constant 0 : i32
    return %arg0, %arg1, %c0_i32, %c0_i32_0 : i32, i32, i32, i32
  }
}

</mosaic_0001>

<bundles_post_ra>
// kernel: hindex_encoder_forward.2
= control target key start
LH: loop header
LB: loop body
LE: loop exit
PB: predicated region body
PF: predicated region fallthrough
CT: control target
= control target key end

     0   :  { %v1566_v0 = vmov 0   ;;  %vm1143_vm0 = vcmask 257024   ;;  %s2184_s1 = inlined_call_operand.vmem [shape: bf16[256,32], index: 1, kind: input, shape index: {}]   ;;  %s2185_s0 = inlined_call_operand.vmem [shape: bf16[512,256], index: 0, kind: input, shape index: {}]   ;;  %s2186_s2 = inlined_call_operand.vmem [shape: f32[1,32], index: 2, kind: input, shape index: {}]   ;;  %s2187_s3 = inlined_call_operand.vmem [shape: bf16[512,32], index: 3, kind: output, shape index: {}]  }
   0x1   :  { %534 = vmatprep.subr.bf16.mxu0 %v1566_v0  ;;  %1421 = vmatprep.subr.bf16.mxu1 %v1566_v0  ;;  %v1454_v1 = vld [vmem:[%s2184_s1] sm:$0xff]   ;;  %v1455_v2 = vld [vmem:[%s2184_s1 + $0x8] sm:$0xff]   ;;  %v1456_v3 = vld [vmem:[%s2184_s1 + $0x10] sm:$0xff]  }
   0x2   :  { %535 = vmatpush1.bf16.msra.mxu0 %v1454_v1  ;;  %1437 = vmatpush1.bf16.msra.mxu1 %v1454_v1  ;;  %v1457_v4 = vld [vmem:[%s2184_s1 + $0x18] sm:$0xff]   ;;  %v1458_v5 = vld [vmem:[%s2184_s1 + $0x20] sm:$0xff]   ;;  %v1459_v7 = vld [vmem:[%s2184_s1 + $0x28] sm:$0xff]  }
   0x3   :  { %536 = vmatprep.subr.bf16.mxu0 %v1566_v0  ;;  %1422 = vmatprep.subr.bf16.mxu1 %v1566_v0  ;;  %v1472_v6 = vld [vmem:[%s2185_s0 + $0x4] ss:$8 sps:$4 sm:$0xff]   ;;  %v1460_v9 = vld [vmem:[%s2184_s1 + $0x30] sm:$0xff]   ;;  %v1461_v10 = vld [vmem:[%s2184_s1 + $0x38] sm:$0xff]  }
   0x4   :  { %v1475_v8 = vld [vmem:[%s2185_s0 + $0x104] ss:$8 sps:$4 sm:$0xff]   ;;  %566 = vmatprep.mubr.bf16.mxu0 %v1472_v6  ;;  %v1464_v13 = vld [vmem:[%s2184_s1 + $0x50] sm:$0xff]   ;;  %v1465_v14 = vld [vmem:[%s2184_s1 + $0x58] sm:$0xff]  }
   0x5   :  { %694 = vmatprep.mubr.bf16.mxu1 %v1475_v8  ;;  %v1462_v11 = vld [vmem:[%s2184_s1 + $0x40] sm:$0xff]   ;;  %v1463_v12 = vld [vmem:[%s2184_s1 + $0x48] sm:$0xff]   ;;  %v1468_v17 = vld [vmem:[%s2184_s1 + $0x70] sm:$0xff]  }
   0x6   :  { %537 = vmatpush1.bf16.msra.mxu0 %v1455_v2  ;;  %1438 = vmatpush1.bf16.msra.mxu1 %v1455_v2  ;;  %v1466_v15 = vld [vmem:[%s2184_s1 + $0x60] sm:$0xff]   ;;  %v1467_v16 = vld [vmem:[%s2184_s1 + $0x68] sm:$0xff]   ;;  %v1469_v18 = vld [vmem:[%s2184_s1 + $0x78] sm:$0xff]  }
   0x7   :  { %538 = vmatprep.subr.bf16.mxu0 %v1566_v0  ;;  %1423 = vmatprep.subr.bf16.mxu1 %v1566_v0  ;;  %v1470_v19 = vld [vmem:[%s2185_s0] ss:$8 sps:$4 sm:$0xff]   ;;  %v1476_v21 = vld [vmem:[%s2185_s0 + $0x14] ss:$8 sps:$4 sm:$0xff]   ;;  %v1480_v23 = vld [vmem:[%s2185_s0 + $0x10] ss:$8 sps:$4 sm:$0xff]  }
   0x8   :  { %v1473_v20 = vld [vmem:[%s2185_s0 + $0x100] ss:$8 sps:$4 sm:$0xff]   ;;  %v1478_v22 = vld [vmem:[%s2185_s0 + $0x114] ss:$8 sps:$4 sm:$0xff]   ;;  %v1481_v24 = vld [vmem:[%s2185_s0 + $0x110] ss:$8 sps:$4 sm:$0xff]  }
   0x9   :  { %v1482_v25 = vld [vmem:[%s2185_s0 + $0x24] ss:$8 sps:$4 sm:$0xff]   ;;  %v1486_v27 = vld [vmem:[%s2185_s0 + $0x20] ss:$8 sps:$4 sm:$0xff]   ;;  %v1488_v29 = vld [vmem:[%s2185_s0 + $0x34] ss:$8 sps:$4 sm:$0xff]  }
   0xa   :  { %539 = vmatpush1.bf16.msra.mxu0 %v1456_v3  ;;  %1439 = vmatpush1.bf16.msra.mxu1 %v1456_v3  ;;  %v1484_v26 = vld [vmem:[%s2185_s0 + $0x124] ss:$8 sps:$4 sm:$0xff]   ;;  %v1487_v28 = vld [vmem:[%s2185_s0 + $0x120] ss:$8 sps:$4 sm:$0xff]   ;;  %v1490_v30 = vld [vmem:[%s2185_s0 + $0x134] ss:$8 sps:$4 sm:$0xff]  }
   0xb   :  { %540 = vmatprep.subr.bf16.mxu0 %v1566_v0  ;;  %1424 = vmatprep.subr.bf16.mxu1 %v1566_v0  ;;  %v1492_v31 = vld [vmem:[%s2185_s0 + $0x30] ss:$8 sps:$4 sm:$0xff]   ;;  %v1494_v33 = vld [vmem:[%s2185_s0 + $0x44] ss:$8 sps:$4 sm:$0xff]   ;;  %v1498_v35 = vld [vmem:[%s2185_s0 + $0x40] ss:$8 sps:$4 sm:$0xff]  }
   0xc   :  { %v1493_v32 = vld [vmem:[%s2185_s0 + $0x130] ss:$8 sps:$4 sm:$0xff]   ;;  %v1496_v34 = vld [vmem:[%s2185_s0 + $0x144] ss:$8 sps:$4 sm:$0xff]   ;;  %v1499_v36 = vld [vmem:[%s2185_s0 + $0x140] ss:$8 sps:$4 sm:$0xff]  }
   0xd   :  { %v1500_v37 = vld [vmem:[%s2185_s0 + $0x54] ss:$8 sps:$4 sm:$0xff]   ;;  %v1504_v39 = vld [vmem:[%s2185_s0 + $0x50] ss:$8 sps:$4 sm:$0xff]   ;;  %v1506_v41 = vld [vmem:[%s2185_s0 + $0x64] ss:$8 sps:$4 sm:$0xff]  }
   0xe   :  { %541 = vmatpush1.bf16.msra.mxu0 %v1457_v4  ;;  %1440 = vmatpush1.bf16.msra.mxu1 %v1457_v4  ;;  %v1502_v38 = vld [vmem:[%s2185_s0 + $0x154] ss:$8 sps:$4 sm:$0xff]   ;;  %v1505_v40 = vld [vmem:[%s2185_s0 + $0x150] ss:$8 sps:$4 sm:$0xff]   ;;  %v1508_v42 = vld [vmem:[%s2185_s0 + $0x164] ss:$8 sps:$4 sm:$0xff]  }
   0xf   :  { %542 = vmatprep.subr.bf16.mxu0 %v1566_v0  ;;  %1425 = vmatprep.subr.bf16.mxu1 %v1566_v0  ;;  %v1510_v43 = vld [vmem:[%s2185_s0 + $0x60] ss:$8 sps:$4 sm:$0xff]   ;;  %v1512_v45 = vld [vmem:[%s2185_s0 + $0x74] ss:$8 sps:$4 sm:$0xff]   ;;  %v1516_v47 = vld [vmem:[%s2185_s0 + $0x70] ss:$8 sps:$4 sm:$0xff]  }
  0x10   :  { %v1511_v44 = vld [vmem:[%s2185_s0 + $0x160] ss:$8 sps:$4 sm:$0xff]   ;;  %v1514_v46 = vld [vmem:[%s2185_s0 + $0x174] ss:$8 sps:$4 sm:$0xff]   ;;  %v1517_v48 = vld [vmem:[%s2185_s0 + $0x170] ss:$8 sps:$4 sm:$0xff]  }
  0x11   :  { %v1518_v49 = vld [vmem:[%s2185_s0 + $0x84] ss:$8 sps:$4 sm:$0xff]   ;;  %v1522_v51 = vld [vmem:[%s2185_s0 + $0x80] ss:$8 sps:$4 sm:$0xff]   ;;  %v1524_v53 = vld [vmem:[%s2185_s0 + $0x94] ss:$8 sps:$4 sm:$0xff]  }
  0x12   :  { %543 = vmatpush1.bf16.msra.mxu0 %v1458_v5  ;;  %1441 = vmatpush1.bf16.msra.mxu1 %v1458_v5  ;;  %v1520_v50 = vld [vmem:[%s2185_s0 + $0x184] ss:$8 sps:$4 sm:$0xff]   ;;  %v1523_v52 = vld [vmem:[%s2185_s0 + $0x180] ss:$8 sps:$4 sm:$0xff]   ;;  %v1526_v54 = vld [vmem:[%s2185_s0 + $0x194] ss:$8 sps:$4 sm:$0xff]  }
  0x13   :  { %544 = vmatprep.subr.bf16.mxu0 %v1566_v0  ;;  %1426 = vmatprep.subr.bf16.mxu1 %v1566_v0  ;;  %v1528_v55 = vld [vmem:[%s2185_s0 + $0x90] ss:$8 sps:$4 sm:$0xff]   ;;  %v1530_v57 = vld [vmem:[%s2185_s0 + $0xa4] ss:$8 sps:$4 sm:$0xff]   ;;  %v1534_v59 = vld [vmem:[%s2185_s0 + $0xa0] ss:$8 sps:$4 sm:$0xff]  }
  0x14   :  { %v1529_v56 = vld [vmem:[%s2185_s0 + $0x190] ss:$8 sps:$4 sm:$0xff]   ;;  %v1532_v58 = vld [vmem:[%s2185_s0 + $0x1a4] ss:$8 sps:$4 sm:$0xff]   ;;  %v1535_v60 = vld [vmem:[%s2185_s0 + $0x1a0] ss:$8 sps:$4 sm:$0xff]  }
  0x15   :  { %v1536_v61 = vld [vmem:[%s2185_s0 + $0xb4] ss:$8 sps:$4 sm:$0xff]   ;;  %v1540_v63 = vld [vmem:[%s2185_s0 + $0xb0] ss:$8 sps:$4 sm:$0xff]   ;;  %v1542_v1 = vld [vmem:[%s2185_s0 + $0xc4] ss:$8 sps:$4 sm:$0xff]  }
  0x16   :  { %545 = vmatpush1.bf16.msra.mxu0 %v1459_v7  ;;  %1442 = vmatpush1.bf16.msra.mxu1 %v1459_v7  ;;  %v1538_v62 = vld [vmem:[%s2185_s0 + $0x1b4] ss:$8 sps:$4 sm:$0xff]   ;;  %v1544_v2 = vld [vmem:[%s2185_s0 + $0x1c4] ss:$8 sps:$4 sm:$0xff]   ;;  %v1546_v3 = vld [vmem:[%s2185_s0 + $0xc0] ss:$8 sps:$4 sm:$0xff]  }
  0x17   :  { %546 = vmatprep.subr.bf16.mxu0 %v1566_v0  ;;  %1427 = vmatprep.subr.bf16.mxu1 %v1566_v0  ;;  %v1547_v4 = vld [vmem:[%s2185_s0 + $0x1c0] ss:$8 sps:$4 sm:$0xff]   ;;  %v1548_v5 = vld [vmem:[%s2185_s0 + $0xd4] ss:$8 sps:$4 sm:$0xff]   ;;  %v1552_v7 = vld [vmem:[%s2185_s0 + $0xd0] ss:$8 sps:$4 sm:$0xff]  }
  0x18   :  { %v1550_v6 = vld [vmem:[%s2185_s0 + $0x1d4] ss:$8 sps:$4 sm:$0xff]   ;;  %v1553_v8 = vld [vmem:[%s2185_s0 + $0x1d0] ss:$8 sps:$4 sm:$0xff]  }
  0x1a   :  { %547 = vmatpush1.bf16.msra.mxu0 %v1460_v9  ;;  %1443 = vmatpush1.bf16.msra.mxu1 %v1460_v9  ;;  %v1554_v9 = vld [vmem:[%s2185_s0 + $0xe4] ss:$8 sps:$4 sm:$0xff]  }
  0x1b   :  { %548 = vmatprep.subr.bf16.mxu0 %v1566_v0  ;;  %1428 = vmatprep.subr.bf16.mxu1 %v1566_v0 }
  0x1e   :  { %549 = vmatpush1.bf16.msra.mxu0 %v1461_v10  ;;  %1444 = vmatpush1.bf16.msra.mxu1 %v1461_v10  ;;  %v1556_v10 = vld [vmem:[%s2185_s0 + $0x1e4] ss:$8 sps:$4 sm:$0xff]  }
  0x1f   :  { %550 = vmatprep.subr.bf16.mxu0 %v1566_v0  ;;  %1429 = vmatprep.subr.bf16.mxu1 %v1566_v0 }
  0x22   :  { %551 = vmatpush1.bf16.msra.mxu0 %v1462_v11  ;;  %1445 = vmatpush1.bf16.msra.mxu1 %v1462_v11  ;;  %v1558_v11 = vld [vmem:[%s2185_s0 + $0xe0] ss:$8 sps:$4 sm:$0xff]  }
  0x23   :  { %552 = vmatprep.subr.bf16.mxu0 %v1566_v0  ;;  %1430 = vmatprep.subr.bf16.mxu1 %v1566_v0 }
  0x26   :  { %553 = vmatpush1.bf16.msra.mxu0 %v1463_v12  ;;  %1446 = vmatpush1.bf16.msra.mxu1 %v1463_v12  ;;  %v1559_v12 = vld [vmem:[%s2185_s0 + $0x1e0] ss:$8 sps:$4 sm:$0xff]  }
  0x27   :  { %554 = vmatprep.subr.bf16.mxu0 %v1566_v0  ;;  %1431 = vmatprep.subr.bf16.mxu1 %v1566_v0 }
  0x2a   :  { %555 = vmatpush1.bf16.msra.mxu0 %v1464_v13  ;;  %1447 = vmatpush1.bf16.msra.mxu1 %v1464_v13  ;;  %v1560_v13 = vld [vmem:[%s2185_s0 + $0xf4] ss:$8 sps:$4 sm:$0xff]  }
  0x2b   :  { %556 = vmatprep.subr.bf16.mxu0 %v1566_v0  ;;  %1432 = vmatprep.subr.bf16.mxu1 %v1566_v0 }
  0x2e   :  { %557 = vmatpush1.bf16.msra.mxu0 %v1465_v14  ;;  %1448 = vmatpush1.bf16.msra.mxu1 %v1465_v14  ;;  %v1562_v14 = vld [vmem:[%s2185_s0 + $0x1f4] ss:$8 sps:$4 sm:$0xff]  }
  0x2f   :  { %558 = vmatprep.subr.bf16.mxu0 %v1566_v0  ;;  %1433 = vmatprep.subr.bf16.mxu1 %v1566_v0 }
  0x32   :  { %559 = vmatpush1.bf16.msra.mxu0 %v1466_v15  ;;  %1449 = vmatpush1.bf16.msra.mxu1 %v1466_v15  ;;  %v1564_v15 = vld [vmem:[%s2185_s0 + $0xf0] ss:$8 sps:$4 sm:$0xff]  }
  0x33   :  { %560 = vmatprep.subr.bf16.mxu0 %v1566_v0  ;;  %1434 = vmatprep.subr.bf16.mxu1 %v1566_v0 }
  0x36   :  { %561 = vmatpush1.bf16.msra.mxu0 %v1467_v16  ;;  %1450 = vmatpush1.bf16.msra.mxu1 %v1467_v16  ;;  %v1565_v16 = vld [vmem:[%s2185_s0 + $0x1f0] ss:$8 sps:$4 sm:$0xff]  }
  0x37   :  { %562 = vmatprep.subr.bf16.mxu0 %v1566_v0  ;;  %1435 = vmatprep.subr.bf16.mxu1 %v1566_v0 }
  0x3a   :  { %563 = vmatpush1.bf16.msra.mxu0 %v1468_v17  ;;  %1451 = vmatpush1.bf16.msra.mxu1 %v1468_v17  ;;  %v1862_v17 = vld [vmem:[%s2186_s2] ss:$0 sm:$0xff] }
  0x3b   :  { %564 = vmatprep.subr.bf16.mxu0 %v1566_v0  ;;  %1436 = vmatprep.subr.bf16.mxu1 %v1566_v0  ;;  %v1541_v0 = vld [vmem:[%s2185_s0 + $0x1b0] ss:$8 sps:$4 sm:$0xff]  }
  0x3e   :  { %565 = vmatpush1.bf16.msra.mxu0 %v1469_v18  ;;  %1452 = vmatpush1.bf16.msra.mxu1 %v1469_v18 }
  0x41   :  { %567 = vmatmul.mubr.bf16.vlgmr.msra.gmra.mrb[0].mxu0 %v1470_v19  ;;  %695 = vmatmul.mubr.bf16.vlgmr.msra.gmra.mrb[0].mxu1 %v1473_v20 }
  0x42   :  { %574 = vmatprep.mubr.bf16.mxu0 %v1476_v21  ;;  %702 = vmatprep.mubr.bf16.mxu1 %v1478_v22 }
  0x49   :  { %575 = vmatmul.mubr.bf16.gmra.mrb[4].mxu0 %v1480_v23  ;;  %703 = vmatmul.mubr.bf16.gmra.mrb[4].mxu1 %v1481_v24 }
  0x4a   :  { %582 = vmatprep.mubr.bf16.mxu0 %v1482_v25  ;;  %710 = vmatprep.mubr.bf16.mxu1 %v1484_v26 }
  0x51   :  { %583 = vmatmul.mubr.bf16.gmra.mrb[8].mxu0 %v1486_v27  ;;  %711 = vmatmul.mubr.bf16.gmra.mrb[8].mxu1 %v1487_v28 }
  0x52   :  { %590 = vmatprep.mubr.bf16.mxu0 %v1488_v29  ;;  %718 = vmatprep.mubr.bf16.mxu1 %v1490_v30 }
  0x59   :  { %591 = vmatmul.mubr.bf16.gmra.mrb[12].mxu0 %v1492_v31  ;;  %719 = vmatmul.mubr.bf16.gmra.mrb[12].mxu1 %v1493_v32 }
  0x5a   :  { %598 = vmatprep.mubr.bf16.mxu0 %v1494_v33  ;;  %726 = vmatprep.mubr.bf16.mxu1 %v1496_v34 }
  0x61   :  { %599 = vmatmul.mubr.bf16.gmra.mrb[16].mxu0 %v1498_v35  ;;  %727 = vmatmul.mubr.bf16.gmra.mrb[16].mxu1 %v1499_v36 }
  0x62   :  { %606 = vmatprep.mubr.bf16.mxu0 %v1500_v37  ;;  %734 = vmatprep.mubr.bf16.mxu1 %v1502_v38 }
  0x69   :  { %607 = vmatmul.mubr.bf16.gmra.mrb[20].mxu0 %v1504_v39  ;;  %735 = vmatmul.mubr.bf16.gmra.mrb[20].mxu1 %v1505_v40 }
  0x6a   :  { %614 = vmatprep.mubr.bf16.mxu0 %v1506_v41  ;;  %742 = vmatprep.mubr.bf16.mxu1 %v1508_v42 }
  0x71   :  { %615 = vmatmul.mubr.bf16.gmra.mrb[24].mxu0 %v1510_v43  ;;  %743 = vmatmul.mubr.bf16.gmra.mrb[24].mxu1 %v1511_v44 }
  0x72   :  { %622 = vmatprep.mubr.bf16.mxu0 %v1512_v45  ;;  %750 = vmatprep.mubr.bf16.mxu1 %v1514_v46 }
  0x79   :  { %623 = vmatmul.mubr.bf16.gmra.mrb[28].mxu0 %v1516_v47  ;;  %751 = vmatmul.mubr.bf16.gmra.mrb[28].mxu1 %v1517_v48 }
  0x7a   :  { %630 = vmatprep.mubr.bf16.mxu0 %v1518_v49  ;;  %758 = vmatprep.mubr.bf16.mxu1 %v1520_v50 }
  0x81   :  { %631 = vmatmul.mubr.bf16.gmra.mrb[32].mxu0 %v1522_v51  ;;  %759 = vmatmul.mubr.bf16.gmra.mrb[32].mxu1 %v1523_v52 }
  0x82   :  { %638 = vmatprep.mubr.bf16.mxu0 %v1524_v53  ;;  %766 = vmatprep.mubr.bf16.mxu1 %v1526_v54 }
  0x89   :  { %639 = vmatmul.mubr.bf16.gmra.mrb[36].mxu0 %v1528_v55  ;;  %767 = vmatmul.mubr.bf16.gmra.mrb[36].mxu1 %v1529_v56 }
  0x8a   :  { %646 = vmatprep.mubr.bf16.mxu0 %v1530_v57  ;;  %774 = vmatprep.mubr.bf16.mxu1 %v1532_v58 }
  0x91   :  { %647 = vmatmul.mubr.bf16.gmra.mrb[40].mxu0 %v1534_v59  ;;  %775 = vmatmul.mubr.bf16.gmra.mrb[40].mxu1 %v1535_v60 }
  0x92   :  { %654 = vmatprep.mubr.bf16.mxu0 %v1536_v61  ;;  %782 = vmatprep.mubr.bf16.mxu1 %v1538_v62 }
  0x99   :  { %655 = vmatmul.mubr.bf16.gmra.mrb[44].mxu0 %v1540_v63  ;;  %783 = vmatmul.mubr.bf16.gmra.mrb[44].mxu1 %v1541_v0 }
  0x9a   :  { %662 = vmatprep.mubr.bf16.mxu0 %v1542_v1  ;;  %790 = vmatprep.mubr.bf16.mxu1 %v1544_v2 }
  0xa1   :  { %663 = vmatmul.mubr.bf16.gmra.mrb[48].mxu0 %v1546_v3  ;;  %791 = vmatmul.mubr.bf16.gmra.mrb[48].mxu1 %v1547_v4 }
  0xa2   :  { %670 = vmatprep.mubr.bf16.mxu0 %v1548_v5  ;;  %798 = vmatprep.mubr.bf16.mxu1 %v1550_v6 }
  0xa9   :  { %671 = vmatmul.mubr.bf16.gmra.mrb[52].mxu0 %v1552_v7  ;;  %799 = vmatmul.mubr.bf16.gmra.mrb[52].mxu1 %v1553_v8 }
  0xaa   :  { %678 = vmatprep.mubr.bf16.mxu0 %v1554_v9  ;;  %806 = vmatprep.mubr.bf16.mxu1 %v1556_v10 }
  0xb1   :  { %679 = vmatmul.mubr.bf16.gmra.mrb[56].mxu0 %v1558_v11  ;;  %807 = vmatmul.mubr.bf16.gmra.mrb[56].mxu1 %v1559_v12 }
  0xb2   :  { %686 = vmatprep.mubr.bf16.mxu0 %v1560_v13  ;;  %814 = vmatprep.mubr.bf16.mxu1 %v1562_v14 }
  0xb9   :  { %687 = vmatmul.mubr.bf16.gmra.mrb[60].mxu0 %v1564_v15  ;;  %815 = vmatmul.mubr.bf16.gmra.mrb[60].mxu1 %v1565_v16 }
 0x114   :  { %v568_v18 = vpop.f32.mrb[0].mxu0  ;;  %v696_v19 = vpop.f32.mrb[0].mxu1 }
 0x115   :  { %v569_v20 = vadd.f32 %v1862_v17, %v568_v18  ;;  %v697_v21 = vadd.f32 %v1862_v17, %v696_v19  ;;  %v570_v22 = vpop.f32.mrb[1].mxu0  ;;  %v698_v23 = vpop.f32.mrb[1].mxu1 }
 0x116   :  { %v571_v24 = vpop.f32.mrb[2].mxu0  ;;  %v699_v25 = vpop.f32.mrb[2].mxu1 }
 0x117   :  { %v823_v26 = vmax.f32 %v569_v20, 0.0  ;;  %v855_v27 = vmax.f32 %v697_v21, 0.0  ;;  %v572_v28 = vadd.f32 %v1862_v17, %v571_v24  ;;  %v700_v29 = vadd.f32 %v1862_v17, %v699_v25  ;;  %v573_v30 = vpop.f32.mrb[3].mxu0  ;;  %v701_v31 = vpop.f32.mrb[3].mxu1 }
 0x119   :  { %v1357_v32 = vpack.c.bf16 %v823_v26, %v823_v26  ;;  %v1389_v33 = vpack.c.bf16 %v855_v27, %v855_v27  ;;  %v824_v34 = vmax.f32 %v572_v28, 0.0  ;;  %v856_v35 = vmax.f32 %v700_v29, 0.0 }
 0x11b   :  { %1144 = vst.msk [vmem:[%s2187_s3] sm:$0xf] %vm1143_vm0, %v1357_v32  ;;  %1176 = vst.msk [vmem:[%s2187_s3 + $0x80] sm:$0xf] %vm1143_vm0, %v1389_v33  ;;  %v1358_v36 = vpack.c.bf16 %v824_v34, %v824_v34  ;;  %v1390_v37 = vpack.c.bf16 %v856_v35, %v856_v35 }
 0x11c   :  { %v576_v38 = vpop.f32.mrb[4].mxu0  ;;  %v704_v39 = vpop.f32.mrb[4].mxu1 }
 0x11d   :  { %1145 = vst.msk [vmem:[%s2187_s3 + $0x4] sm:$0xf] %vm1143_vm0, %v1358_v36  ;;  %1177 = vst.msk [vmem:[%s2187_s3 + $0x84] sm:$0xf] %vm1143_vm0, %v1390_v37  ;;  %v577_v40 = vadd.f32 %v1862_v17, %v576_v38  ;;  %v705_v41 = vadd.f32 %v1862_v17, %v704_v39  ;;  %v578_v42 = vpop.f32.mrb[5].mxu0  ;;  %v706_v43 = vpop.f32.mrb[5].mxu1 }
 0x11e   :  { %v579_v44 = vpop.f32.mrb[6].mxu0  ;;  %v707_v45 = vpop.f32.mrb[6].mxu1 }
 0x11f   :  { %v825_v46 = vmax.f32 %v577_v40, 0.0  ;;  %v857_v47 = vmax.f32 %v705_v41, 0.0  ;;  %v580_v48 = vadd.f32 %v1862_v17, %v579_v44  ;;  %v708_v49 = vadd.f32 %v1862_v17, %v707_v45  ;;  %v581_v50 = vpop.f32.mrb[7].mxu0  ;;  %v709_v51 = vpop.f32.mrb[7].mxu1 }
 0x121   :  { %v1359_v52 = vpack.c.bf16 %v825_v46, %v825_v46  ;;  %v1391_v53 = vpack.c.bf16 %v857_v47, %v857_v47  ;;  %v826_v54 = vmax.f32 %v580_v48, 0.0  ;;  %v858_v55 = vmax.f32 %v708_v49, 0.0 }
 0x123   :  { %1146 = vst.msk [vmem:[%s2187_s3 + $0x8] sm:$0xf] %vm1143_vm0, %v1359_v52  ;;  %1178 = vst.msk [vmem:[%s2187_s3 + $0x88] sm:$0xf] %vm1143_vm0, %v1391_v53  ;;  %v1360_v56 = vpack.c.bf16 %v826_v54, %v826_v54  ;;  %v1392_v57 = vpack.c.bf16 %v858_v55, %v858_v55 }
 0x124   :  { %v584_v58 = vpop.f32.mrb[8].mxu0  ;;  %v712_v59 = vpop.f32.mrb[8].mxu1 }
 0x125   :  { %1147 = vst.msk [vmem:[%s2187_s3 + $0xc] sm:$0xf] %vm1143_vm0, %v1360_v56  ;;  %1179 = vst.msk [vmem:[%s2187_s3 + $0x8c] sm:$0xf] %vm1143_vm0, %v1392_v57  ;;  %v585_v60 = vadd.f32 %v1862_v17, %v584_v58  ;;  %v713_v61 = vadd.f32 %v1862_v17, %v712_v59  ;;  %v586_v62 = vpop.f32.mrb[9].mxu0  ;;  %v714_v63 = vpop.f32.mrb[9].mxu1 }
 0x126   :  { %v587_v0 = vpop.f32.mrb[10].mxu0  ;;  %v715_v1 = vpop.f32.mrb[10].mxu1 }
 0x127   :  { %v827_v2 = vmax.f32 %v585_v60, 0.0  ;;  %v859_v3 = vmax.f32 %v713_v61, 0.0  ;;  %v588_v4 = vadd.f32 %v1862_v17, %v587_v0  ;;  %v716_v5 = vadd.f32 %v1862_v17, %v715_v1  ;;  %v589_v6 = vpop.f32.mrb[11].mxu0  ;;  %v717_v7 = vpop.f32.mrb[11].mxu1 }
 0x129   :  { %v1361_v8 = vpack.c.bf16 %v827_v2, %v827_v2  ;;  %v1393_v9 = vpack.c.bf16 %v859_v3, %v859_v3  ;;  %v828_v10 = vmax.f32 %v588_v4, 0.0  ;;  %v860_v11 = vmax.f32 %v716_v5, 0.0 }
 0x12b   :  { %1148 = vst.msk [vmem:[%s2187_s3 + $0x10] sm:$0xf] %vm1143_vm0, %v1361_v8  ;;  %1180 = vst.msk [vmem:[%s2187_s3 + $0x90] sm:$0xf] %vm1143_vm0, %v1393_v9  ;;  %v1362_v12 = vpack.c.bf16 %v828_v10, %v828_v10  ;;  %v1394_v13 = vpack.c.bf16 %v860_v11, %v860_v11 }
 0x12c   :  { %v592_v14 = vpop.f32.mrb[12].mxu0  ;;  %v720_v15 = vpop.f32.mrb[12].mxu1 }
 0x12d   :  { %1149 = vst.msk [vmem:[%s2187_s3 + $0x14] sm:$0xf] %vm1143_vm0, %v1362_v12  ;;  %1181 = vst.msk [vmem:[%s2187_s3 + $0x94] sm:$0xf] %vm1143_vm0, %v1394_v13  ;;  %v593_v16 = vadd.f32 %v1862_v17, %v592_v14  ;;  %v721_v18 = vadd.f32 %v1862_v17, %v720_v15  ;;  %v594_v19 = vpop.f32.mrb[13].mxu0  ;;  %v722_v20 = vpop.f32.mrb[13].mxu1 }
 0x12e   :  { %v595_v21 = vpop.f32.mrb[14].mxu0  ;;  %v723_v22 = vpop.f32.mrb[14].mxu1 }
 0x12f   :  { %v829_v23 = vmax.f32 %v593_v16, 0.0  ;;  %v861_v24 = vmax.f32 %v721_v18, 0.0  ;;  %v596_v25 = vadd.f32 %v1862_v17, %v595_v21  ;;  %v724_v26 = vadd.f32 %v1862_v17, %v723_v22  ;;  %v597_v27 = vpop.f32.mrb[15].mxu0  ;;  %v725_v28 = vpop.f32.mrb[15].mxu1 }
 0x131   :  { %v1363_v29 = vpack.c.bf16 %v829_v23, %v829_v23  ;;  %v1395_v30 = vpack.c.bf16 %v861_v24, %v861_v24  ;;  %v830_v31 = vmax.f32 %v596_v25, 0.0  ;;  %v862_v32 = vmax.f32 %v724_v26, 0.0 }
 0x133   :  { %1150 = vst.msk [vmem:[%s2187_s3 + $0x18] sm:$0xf] %vm1143_vm0, %v1363_v29  ;;  %1182 = vst.msk [vmem:[%s2187_s3 + $0x98] sm:$0xf] %vm1143_vm0, %v1395_v30  ;;  %v1364_v33 = vpack.c.bf16 %v830_v31, %v830_v31  ;;  %v1396_v34 = vpack.c.bf16 %v862_v32, %v862_v32 }
 0x134   :  { %v600_v35 = vpop.f32.mrb[16].mxu0  ;;  %v728_v36 = vpop.f32.mrb[16].mxu1 }
 0x135   :  { %1151 = vst.msk [vmem:[%s2187_s3 + $0x1c] sm:$0xf] %vm1143_vm0, %v1364_v33  ;;  %1183 = vst.msk [vmem:[%s2187_s3 + $0x9c] sm:$0xf] %vm1143_vm0, %v1396_v34  ;;  %v601_v37 = vadd.f32 %v1862_v17, %v600_v35  ;;  %v729_v38 = vadd.f32 %v1862_v17, %v728_v36  ;;  %v602_v39 = vpop.f32.mrb[17].mxu0  ;;  %v730_v40 = vpop.f32.mrb[17].mxu1 }
 0x136   :  { %v603_v41 = vpop.f32.mrb[18].mxu0  ;;  %v731_v42 = vpop.f32.mrb[18].mxu1 }
 0x137   :  { %v831_v43 = vmax.f32 %v601_v37, 0.0  ;;  %v863_v44 = vmax.f32 %v729_v38, 0.0  ;;  %v604_v45 = vadd.f32 %v1862_v17, %v603_v41  ;;  %v732_v46 = vadd.f32 %v1862_v17, %v731_v42  ;;  %v605_v47 = vpop.f32.mrb[19].mxu0  ;;  %v733_v48 = vpop.f32.mrb[19].mxu1 }
 0x139   :  { %v1365_v49 = vpack.c.bf16 %v831_v43, %v831_v43  ;;  %v1397_v50 = vpack.c.bf16 %v863_v44, %v863_v44  ;;  %v832_v51 = vmax.f32 %v604_v45, 0.0  ;;  %v864_v52 = vmax.f32 %v732_v46, 0.0 }
 0x13b   :  { %1152 = vst.msk [vmem:[%s2187_s3 + $0x20] sm:$0xf] %vm1143_vm0, %v1365_v49  ;;  %1184 = vst.msk [vmem:[%s2187_s3 + $0xa0] sm:$0xf] %vm1143_vm0, %v1397_v50  ;;  %v1366_v53 = vpack.c.bf16 %v832_v51, %v832_v51  ;;  %v1398_v54 = vpack.c.bf16 %v864_v52, %v864_v52 }
 0x13c   :  { %v608_v55 = vpop.f32.mrb[20].mxu0  ;;  %v736_v56 = vpop.f32.mrb[20].mxu1 }
 0x13d   :  { %1153 = vst.msk [vmem:[%s2187_s3 + $0x24] sm:$0xf] %vm1143_vm0, %v1366_v53  ;;  %1185 = vst.msk [vmem:[%s2187_s3 + $0xa4] sm:$0xf] %vm1143_vm0, %v1398_v54  ;;  %v609_v57 = vadd.f32 %v1862_v17, %v608_v55  ;;  %v737_v58 = vadd.f32 %v1862_v17, %v736_v56  ;;  %v610_v59 = vpop.f32.mrb[21].mxu0  ;;  %v738_v60 = vpop.f32.mrb[21].mxu1 }
 0x13e   :  { %v611_v61 = vpop.f32.mrb[22].mxu0  ;;  %v739_v62 = vpop.f32.mrb[22].mxu1 }
 0x13f   :  { %v833_v63 = vmax.f32 %v609_v57, 0.0  ;;  %v865_v0 = vmax.f32 %v737_v58, 0.0  ;;  %v612_v1 = vadd.f32 %v1862_v17, %v611_v61  ;;  %v740_v2 = vadd.f32 %v1862_v17, %v739_v62  ;;  %v613_v3 = vpop.f32.mrb[23].mxu0  ;;  %v741_v4 = vpop.f32.mrb[23].mxu1 }
 0x141   :  { %v1367_v5 = vpack.c.bf16 %v833_v63, %v833_v63  ;;  %v1399_v6 = vpack.c.bf16 %v865_v0, %v865_v0  ;;  %v834_v7 = vmax.f32 %v612_v1, 0.0  ;;  %v866_v8 = vmax.f32 %v740_v2, 0.0 }
 0x143   :  { %1154 = vst.msk [vmem:[%s2187_s3 + $0x28] sm:$0xf] %vm1143_vm0, %v1367_v5  ;;  %1186 = vst.msk [vmem:[%s2187_s3 + $0xa8] sm:$0xf] %vm1143_vm0, %v1399_v6  ;;  %v1368_v9 = vpack.c.bf16 %v834_v7, %v834_v7  ;;  %v1400_v10 = vpack.c.bf16 %v866_v8, %v866_v8 }
 0x144   :  { %v616_v11 = vpop.f32.mrb[24].mxu0  ;;  %v744_v12 = vpop.f32.mrb[24].mxu1 }
 0x145   :  { %1155 = vst.msk [vmem:[%s2187_s3 + $0x2c] sm:$0xf] %vm1143_vm0, %v1368_v9  ;;  %1187 = vst.msk [vmem:[%s2187_s3 + $0xac] sm:$0xf] %vm1143_vm0, %v1400_v10  ;;  %v617_v13 = vadd.f32 %v1862_v17, %v616_v11  ;;  %v745_v14 = vadd.f32 %v1862_v17, %v744_v12  ;;  %v618_v15 = vpop.f32.mrb[25].mxu0  ;;  %v746_v16 = vpop.f32.mrb[25].mxu1 }
 0x146   :  { %v619_v18 = vpop.f32.mrb[26].mxu0  ;;  %v747_v19 = vpop.f32.mrb[26].mxu1 }
 0x147   :  { %v835_v20 = vmax.f32 %v617_v13, 0.0  ;;  %v867_v21 = vmax.f32 %v745_v14, 0.0  ;;  %v620_v22 = vadd.f32 %v1862_v17, %v619_v18  ;;  %v748_v23 = vadd.f32 %v1862_v17, %v747_v19  ;;  %v621_v24 = vpop.f32.mrb[27].mxu0  ;;  %v749_v25 = vpop.f32.mrb[27].mxu1 }
 0x149   :  { %v1369_v26 = vpack.c.bf16 %v835_v20, %v835_v20  ;;  %v1401_v27 = vpack.c.bf16 %v867_v21, %v867_v21  ;;  %v836_v28 = vmax.f32 %v620_v22, 0.0  ;;  %v868_v29 = vmax.f32 %v748_v23, 0.0 }
 0x14b   :  { %1156 = vst.msk [vmem:[%s2187_s3 + $0x30] sm:$0xf] %vm1143_vm0, %v1369_v26  ;;  %1188 = vst.msk [vmem:[%s2187_s3 + $0xb0] sm:$0xf] %vm1143_vm0, %v1401_v27  ;;  %v1370_v30 = vpack.c.bf16 %v836_v28, %v836_v28  ;;  %v1402_v31 = vpack.c.bf16 %v868_v29, %v868_v29 }
 0x14c   :  { %v624_v32 = vpop.f32.mrb[28].mxu0  ;;  %v752_v33 = vpop.f32.mrb[28].mxu1 }
 0x14d   :  { %1157 = vst.msk [vmem:[%s2187_s3 + $0x34] sm:$0xf] %vm1143_vm0, %v1370_v30  ;;  %1189 = vst.msk [vmem:[%s2187_s3 + $0xb4] sm:$0xf] %vm1143_vm0, %v1402_v31  ;;  %v625_v34 = vadd.f32 %v1862_v17, %v624_v32  ;;  %v753_v35 = vadd.f32 %v1862_v17, %v752_v33  ;;  %v626_v36 = vpop.f32.mrb[29].mxu0  ;;  %v754_v37 = vpop.f32.mrb[29].mxu1 }
 0x14e   :  { %v627_v38 = vpop.f32.mrb[30].mxu0  ;;  %v755_v39 = vpop.f32.mrb[30].mxu1 }
 0x14f   :  { %v837_v40 = vmax.f32 %v625_v34, 0.0  ;;  %v869_v41 = vmax.f32 %v753_v35, 0.0  ;;  %v628_v42 = vadd.f32 %v1862_v17, %v627_v38  ;;  %v756_v43 = vadd.f32 %v1862_v17, %v755_v39  ;;  %v629_v44 = vpop.f32.mrb[31].mxu0  ;;  %v757_v45 = vpop.f32.mrb[31].mxu1 }
 0x151   :  { %v1371_v46 = vpack.c.bf16 %v837_v40, %v837_v40  ;;  %v1403_v47 = vpack.c.bf16 %v869_v41, %v869_v41  ;;  %v838_v48 = vmax.f32 %v628_v42, 0.0  ;;  %v870_v49 = vmax.f32 %v756_v43, 0.0 }
 0x153   :  { %1158 = vst.msk [vmem:[%s2187_s3 + $0x38] sm:$0xf] %vm1143_vm0, %v1371_v46  ;;  %1190 = vst.msk [vmem:[%s2187_s3 + $0xb8] sm:$0xf] %vm1143_vm0, %v1403_v47  ;;  %v1372_v50 = vpack.c.bf16 %v838_v48, %v838_v48  ;;  %v1404_v51 = vpack.c.bf16 %v870_v49, %v870_v49 }
 0x154   :  { %v632_v52 = vpop.f32.mrb[32].mxu0  ;;  %v760_v53 = vpop.f32.mrb[32].mxu1 }
 0x155   :  { %1159 = vst.msk [vmem:[%s2187_s3 + $0x3c] sm:$0xf] %vm1143_vm0, %v1372_v50  ;;  %1191 = vst.msk [vmem:[%s2187_s3 + $0xbc] sm:$0xf] %vm1143_vm0, %v1404_v51  ;;  %v633_v54 = vadd.f32 %v1862_v17, %v632_v52  ;;  %v761_v55 = vadd.f32 %v1862_v17, %v760_v53  ;;  %v634_v56 = vpop.f32.mrb[33].mxu0  ;;  %v762_v57 = vpop.f32.mrb[33].mxu1 }
 0x156   :  { %v635_v58 = vpop.f32.mrb[34].mxu0  ;;  %v763_v59 = vpop.f32.mrb[34].mxu1 }
 0x157   :  { %v839_v60 = vmax.f32 %v633_v54, 0.0  ;;  %v871_v61 = vmax.f32 %v761_v55, 0.0  ;;  %v636_v62 = vadd.f32 %v1862_v17, %v635_v58  ;;  %v764_v63 = vadd.f32 %v1862_v17, %v763_v59  ;;  %v637_v0 = vpop.f32.mrb[35].mxu0  ;;  %v765_v1 = vpop.f32.mrb[35].mxu1 }
 0x159   :  { %v1373_v2 = vpack.c.bf16 %v839_v60, %v839_v60  ;;  %v1405_v3 = vpack.c.bf16 %v871_v61, %v871_v61  ;;  %v840_v4 = vmax.f32 %v636_v62, 0.0  ;;  %v872_v5 = vmax.f32 %v764_v63, 0.0 }
 0x15b   :  { %1160 = vst.msk [vmem:[%s2187_s3 + $0x40] sm:$0xf] %vm1143_vm0, %v1373_v2  ;;  %1192 = vst.msk [vmem:[%s2187_s3 + $0xc0] sm:$0xf] %vm1143_vm0, %v1405_v3  ;;  %v1374_v6 = vpack.c.bf16 %v840_v4, %v840_v4  ;;  %v1406_v7 = vpack.c.bf16 %v872_v5, %v872_v5 }
 0x15c   :  { %v640_v8 = vpop.f32.mrb[36].mxu0  ;;  %v768_v9 = vpop.f32.mrb[36].mxu1 }
 0x15d   :  { %1161 = vst.msk [vmem:[%s2187_s3 + $0x44] sm:$0xf] %vm1143_vm0, %v1374_v6  ;;  %1193 = vst.msk [vmem:[%s2187_s3 + $0xc4] sm:$0xf] %vm1143_vm0, %v1406_v7  ;;  %v641_v10 = vadd.f32 %v1862_v17, %v640_v8  ;;  %v769_v11 = vadd.f32 %v1862_v17, %v768_v9  ;;  %v642_v12 = vpop.f32.mrb[37].mxu0  ;;  %v770_v13 = vpop.f32.mrb[37].mxu1 }
 0x15e   :  { %v643_v14 = vpop.f32.mrb[38].mxu0  ;;  %v771_v15 = vpop.f32.mrb[38].mxu1 }
 0x15f   :  { %v841_v16 = vmax.f32 %v641_v10, 0.0  ;;  %v873_v18 = vmax.f32 %v769_v11, 0.0  ;;  %v644_v19 = vadd.f32 %v1862_v17, %v643_v14  ;;  %v772_v20 = vadd.f32 %v1862_v17, %v771_v15  ;;  %v645_v21 = vpop.f32.mrb[39].mxu0  ;;  %v773_v22 = vpop.f32.mrb[39].mxu1 }
 0x161   :  { %v1375_v23 = vpack.c.bf16 %v841_v16, %v841_v16  ;;  %v1407_v24 = vpack.c.bf16 %v873_v18, %v873_v18  ;;  %v842_v25 = vmax.f32 %v644_v19, 0.0  ;;  %v874_v26 = vmax.f32 %v772_v20, 0.0 }
 0x163   :  { %1162 = vst.msk [vmem:[%s2187_s3 + $0x48] sm:$0xf] %vm1143_vm0, %v1375_v23  ;;  %1194 = vst.msk [vmem:[%s2187_s3 + $0xc8] sm:$0xf] %vm1143_vm0, %v1407_v24  ;;  %v1376_v27 = vpack.c.bf16 %v842_v25, %v842_v25  ;;  %v1408_v28 = vpack.c.bf16 %v874_v26, %v874_v26 }
 0x164   :  { %v648_v29 = vpop.f32.mrb[40].mxu0  ;;  %v776_v30 = vpop.f32.mrb[40].mxu1 }
 0x165   :  { %1163 = vst.msk [vmem:[%s2187_s3 + $0x4c] sm:$0xf] %vm1143_vm0, %v1376_v27  ;;  %1195 = vst.msk [vmem:[%s2187_s3 + $0xcc] sm:$0xf] %vm1143_vm0, %v1408_v28  ;;  %v649_v31 = vadd.f32 %v1862_v17, %v648_v29  ;;  %v777_v32 = vadd.f32 %v1862_v17, %v776_v30  ;;  %v650_v33 = vpop.f32.mrb[41].mxu0  ;;  %v778_v34 = vpop.f32.mrb[41].mxu1 }
 0x166   :  { %v651_v35 = vpop.f32.mrb[42].mxu0  ;;  %v779_v36 = vpop.f32.mrb[42].mxu1 }
 0x167   :  { %v843_v37 = vmax.f32 %v649_v31, 0.0  ;;  %v875_v38 = vmax.f32 %v777_v32, 0.0  ;;  %v652_v39 = vadd.f32 %v1862_v17, %v651_v35  ;;  %v780_v40 = vadd.f32 %v1862_v17, %v779_v36  ;;  %v653_v41 = vpop.f32.mrb[43].mxu0  ;;  %v781_v42 = vpop.f32.mrb[43].mxu1 }
 0x169   :  { %v1377_v43 = vpack.c.bf16 %v843_v37, %v843_v37  ;;  %v1409_v44 = vpack.c.bf16 %v875_v38, %v875_v38  ;;  %v844_v45 = vmax.f32 %v652_v39, 0.0  ;;  %v876_v46 = vmax.f32 %v780_v40, 0.0 }
 0x16b   :  { %1164 = vst.msk [vmem:[%s2187_s3 + $0x50] sm:$0xf] %vm1143_vm0, %v1377_v43  ;;  %1196 = vst.msk [vmem:[%s2187_s3 + $0xd0] sm:$0xf] %vm1143_vm0, %v1409_v44  ;;  %v1378_v47 = vpack.c.bf16 %v844_v45, %v844_v45  ;;  %v1410_v48 = vpack.c.bf16 %v876_v46, %v876_v46 }
 0x16c   :  { %v656_v49 = vpop.f32.mrb[44].mxu0  ;;  %v784_v50 = vpop.f32.mrb[44].mxu1 }
 0x16d   :  { %1165 = vst.msk [vmem:[%s2187_s3 + $0x54] sm:$0xf] %vm1143_vm0, %v1378_v47  ;;  %1197 = vst.msk [vmem:[%s2187_s3 + $0xd4] sm:$0xf] %vm1143_vm0, %v1410_v48  ;;  %v657_v51 = vadd.f32 %v1862_v17, %v656_v49  ;;  %v785_v52 = vadd.f32 %v1862_v17, %v784_v50  ;;  %v658_v53 = vpop.f32.mrb[45].mxu0  ;;  %v786_v54 = vpop.f32.mrb[45].mxu1 }
 0x16e   :  { %v659_v55 = vpop.f32.mrb[46].mxu0  ;;  %v787_v56 = vpop.f32.mrb[46].mxu1 }
 0x16f   :  { %v845_v57 = vmax.f32 %v657_v51, 0.0  ;;  %v877_v58 = vmax.f32 %v785_v52, 0.0  ;;  %v660_v59 = vadd.f32 %v1862_v17, %v659_v55  ;;  %v788_v60 = vadd.f32 %v1862_v17, %v787_v56  ;;  %v661_v61 = vpop.f32.mrb[47].mxu0  ;;  %v789_v62 = vpop.f32.mrb[47].mxu1 }
 0x171   :  { %v1379_v63 = vpack.c.bf16 %v845_v57, %v845_v57  ;;  %v1411_v0 = vpack.c.bf16 %v877_v58, %v877_v58  ;;  %v846_v1 = vmax.f32 %v660_v59, 0.0  ;;  %v878_v2 = vmax.f32 %v788_v60, 0.0 }
 0x173   :  { %1166 = vst.msk [vmem:[%s2187_s3 + $0x58] sm:$0xf] %vm1143_vm0, %v1379_v63  ;;  %1198 = vst.msk [vmem:[%s2187_s3 + $0xd8] sm:$0xf] %vm1143_vm0, %v1411_v0  ;;  %v1380_v3 = vpack.c.bf16 %v846_v1, %v846_v1  ;;  %v1412_v4 = vpack.c.bf16 %v878_v2, %v878_v2 }
 0x174   :  { %v664_v5 = vpop.f32.mrb[48].mxu0  ;;  %v792_v6 = vpop.f32.mrb[48].mxu1 }
 0x175   :  { %1167 = vst.msk [vmem:[%s2187_s3 + $0x5c] sm:$0xf] %vm1143_vm0, %v1380_v3  ;;  %1199 = vst.msk [vmem:[%s2187_s3 + $0xdc] sm:$0xf] %vm1143_vm0, %v1412_v4  ;;  %v665_v7 = vadd.f32 %v1862_v17, %v664_v5  ;;  %v793_v8 = vadd.f32 %v1862_v17, %v792_v6  ;;  %v666_v9 = vpop.f32.mrb[49].mxu0  ;;  %v794_v10 = vpop.f32.mrb[49].mxu1 }
 0x176   :  { %v667_v11 = vpop.f32.mrb[50].mxu0  ;;  %v795_v12 = vpop.f32.mrb[50].mxu1 }
 0x177   :  { %v847_v13 = vmax.f32 %v665_v7, 0.0  ;;  %v879_v14 = vmax.f32 %v793_v8, 0.0  ;;  %v668_v15 = vadd.f32 %v1862_v17, %v667_v11  ;;  %v796_v16 = vadd.f32 %v1862_v17, %v795_v12  ;;  %v669_v18 = vpop.f32.mrb[51].mxu0  ;;  %v797_v19 = vpop.f32.mrb[51].mxu1 }
 0x179   :  { %v1381_v20 = vpack.c.bf16 %v847_v13, %v847_v13  ;;  %v1413_v21 = vpack.c.bf16 %v879_v14, %v879_v14  ;;  %v848_v22 = vmax.f32 %v668_v15, 0.0  ;;  %v880_v23 = vmax.f32 %v796_v16, 0.0 }
 0x17b   :  { %1168 = vst.msk [vmem:[%s2187_s3 + $0x60] sm:$0xf] %vm1143_vm0, %v1381_v20  ;;  %1200 = vst.msk [vmem:[%s2187_s3 + $0xe0] sm:$0xf] %vm1143_vm0, %v1413_v21  ;;  %v1382_v24 = vpack.c.bf16 %v848_v22, %v848_v22  ;;  %v1414_v25 = vpack.c.bf16 %v880_v23, %v880_v23 }
 0x17c   :  { %v672_v26 = vpop.f32.mrb[52].mxu0  ;;  %v800_v27 = vpop.f32.mrb[52].mxu1 }
 0x17d   :  { %1169 = vst.msk [vmem:[%s2187_s3 + $0x64] sm:$0xf] %vm1143_vm0, %v1382_v24  ;;  %1201 = vst.msk [vmem:[%s2187_s3 + $0xe4] sm:$0xf] %vm1143_vm0, %v1414_v25  ;;  %v673_v28 = vadd.f32 %v1862_v17, %v672_v26  ;;  %v801_v29 = vadd.f32 %v1862_v17, %v800_v27  ;;  %v674_v30 = vpop.f32.mrb[53].mxu0  ;;  %v802_v31 = vpop.f32.mrb[53].mxu1 }
 0x17e   :  { %v675_v32 = vpop.f32.mrb[54].mxu0  ;;  %v803_v33 = vpop.f32.mrb[54].mxu1 }
 0x17f   :  { %v849_v34 = vmax.f32 %v673_v28, 0.0  ;;  %v881_v35 = vmax.f32 %v801_v29, 0.0  ;;  %v676_v36 = vadd.f32 %v1862_v17, %v675_v32  ;;  %v804_v37 = vadd.f32 %v1862_v17, %v803_v33  ;;  %v677_v38 = vpop.f32.mrb[55].mxu0  ;;  %v805_v39 = vpop.f32.mrb[55].mxu1 }
 0x181   :  { %v1383_v40 = vpack.c.bf16 %v849_v34, %v849_v34  ;;  %v1415_v41 = vpack.c.bf16 %v881_v35, %v881_v35  ;;  %v850_v42 = vmax.f32 %v676_v36, 0.0  ;;  %v882_v43 = vmax.f32 %v804_v37, 0.0 }
 0x183   :  { %1170 = vst.msk [vmem:[%s2187_s3 + $0x68] sm:$0xf] %vm1143_vm0, %v1383_v40  ;;  %1202 = vst.msk [vmem:[%s2187_s3 + $0xe8] sm:$0xf] %vm1143_vm0, %v1415_v41  ;;  %v1384_v44 = vpack.c.bf16 %v850_v42, %v850_v42  ;;  %v1416_v45 = vpack.c.bf16 %v882_v43, %v882_v43 }
 0x184   :  { %v680_v46 = vpop.f32.mrb[56].mxu0  ;;  %v808_v47 = vpop.f32.mrb[56].mxu1 }
 0x185   :  { %1171 = vst.msk [vmem:[%s2187_s3 + $0x6c] sm:$0xf] %vm1143_vm0, %v1384_v44  ;;  %1203 = vst.msk [vmem:[%s2187_s3 + $0xec] sm:$0xf] %vm1143_vm0, %v1416_v45  ;;  %v681_v48 = vadd.f32 %v1862_v17, %v680_v46  ;;  %v809_v49 = vadd.f32 %v1862_v17, %v808_v47  ;;  %v682_v50 = vpop.f32.mrb[57].mxu0  ;;  %v810_v51 = vpop.f32.mrb[57].mxu1 }
 0x186   :  { %v683_v52 = vpop.f32.mrb[58].mxu0  ;;  %v811_v53 = vpop.f32.mrb[58].mxu1 }
 0x187   :  { %v851_v54 = vmax.f32 %v681_v48, 0.0  ;;  %v883_v55 = vmax.f32 %v809_v49, 0.0  ;;  %v684_v56 = vadd.f32 %v1862_v17, %v683_v52  ;;  %v812_v57 = vadd.f32 %v1862_v17, %v811_v53  ;;  %v685_v58 = vpop.f32.mrb[59].mxu0  ;;  %v813_v59 = vpop.f32.mrb[59].mxu1 }
 0x189   :  { %v1385_v60 = vpack.c.bf16 %v851_v54, %v851_v54  ;;  %v1417_v61 = vpack.c.bf16 %v883_v55, %v883_v55  ;;  %v852_v62 = vmax.f32 %v684_v56, 0.0  ;;  %v884_v63 = vmax.f32 %v812_v57, 0.0 }
 0x18b   :  { %1172 = vst.msk [vmem:[%s2187_s3 + $0x70] sm:$0xf] %vm1143_vm0, %v1385_v60  ;;  %1204 = vst.msk [vmem:[%s2187_s3 + $0xf0] sm:$0xf] %vm1143_vm0, %v1417_v61  ;;  %v1386_v0 = vpack.c.bf16 %v852_v62, %v852_v62  ;;  %v1418_v1 = vpack.c.bf16 %v884_v63, %v884_v63 }
 0x18c   :  { %v688_v2 = vpop.f32.mrb[60].mxu0  ;;  %v816_v3 = vpop.f32.mrb[60].mxu1 }
 0x18d   :  { %1173 = vst.msk [vmem:[%s2187_s3 + $0x74] sm:$0xf] %vm1143_vm0, %v1386_v0  ;;  %1205 = vst.msk [vmem:[%s2187_s3 + $0xf4] sm:$0xf] %vm1143_vm0, %v1418_v1  ;;  %v689_v4 = vadd.f32 %v1862_v17, %v688_v2  ;;  %v817_v5 = vadd.f32 %v1862_v17, %v816_v3  ;;  %v690_v6 = vpop.f32.mrb[61].mxu0  ;;  %v818_v7 = vpop.f32.mrb[61].mxu1 }
 0x18e   :  { %v691_v8 = vpop.f32.mrb[62].mxu0  ;;  %v819_v9 = vpop.f32.mrb[62].mxu1 }
 0x18f   :  { %v853_v10 = vmax.f32 %v689_v4, 0.0  ;;  %v885_v11 = vmax.f32 %v817_v5, 0.0  ;;  %v692_v12 = vadd.f32 %v1862_v17, %v691_v8  ;;  %v820_v13 = vadd.f32 %v1862_v17, %v819_v9  ;;  %v693_v14 = vpop.f32.mrb[63].mxu0  ;;  %v821_v15 = vpop.f32.mrb[63].mxu1 }
 0x191   :  { %v1387_v16 = vpack.c.bf16 %v853_v10, %v853_v10  ;;  %v1419_v18 = vpack.c.bf16 %v885_v11, %v885_v11  ;;  %v854_v19 = vmax.f32 %v692_v12, 0.0  ;;  %v886_v20 = vmax.f32 %v820_v13, 0.0 }
 0x193   :  { %1174 = vst.msk [vmem:[%s2187_s3 + $0x78] sm:$0xf] %vm1143_vm0, %v1387_v16  ;;  %1206 = vst.msk [vmem:[%s2187_s3 + $0xf8] sm:$0xf] %vm1143_vm0, %v1419_v18  ;;  %v1388_v21 = vpack.c.bf16 %v854_v19, %v854_v19  ;;  %v1420_v22 = vpack.c.bf16 %v886_v20, %v886_v20 }
 0x195   :  { %1175 = vst.msk [vmem:[%s2187_s3 + $0x7c] sm:$0xf] %vm1143_vm0, %v1388_v21  ;;  %1207 = vst.msk [vmem:[%s2187_s3 + $0xfc] sm:$0xf] %vm1143_vm0, %v1420_v22 }

// kernel: hindex_encoder_forward.3
= control target key start
LH: loop header
LB: loop body
LE: loop exit
PB: predicated region body
PF: predicated region fallthrough
CT: control target
= control target key end

     0   :  { %s1835_s12 = smov 0   ;;  %s1837_s13 = smov 0   ;;  %s2347_s0 = inlined_call_operand.vmem [shape: bf16[2,64,32], index: 0, kind: input, shape index: {}]   ;;  %s2348_s1 = inlined_call_operand.vmem [shape: bf16[32,2048], index: 1, kind: input, shape index: {}]   ;;  %s2349_s2 = inlined_call_operand.vmem [shape: f32[1,2048], index: 2, kind: input, shape index: {}]   ;;  %s2350_s3 = inlined_call_operand.vmem [shape: f32[2,1,1,2048], index: 3, kind: output, shape index: {}]  }
   0x1   :  { %s1839_s14 = smov 0  }
   0x2 LB: > { %s32_s15 = sadd.s32 1, %s1807_s13  ;;  %p1684_p0 = scmp.ge.s32.totalorder %s1811_s14, 1  ;;  %s1811_s14 = sphi %s1839_s14, %s13_s14   ;;  %s1807_s13 = sphi %s1837_s13, %s2352_s13   ;;  %s1803_s12 = sphi %s1835_s12, %s2351_s12  }
   0x3   : > { %p34_p1 = scmp.ge.s32.totalorder %s32_s15, 2  ;;  %p169_p2 = scmp.lt.s32.totalorder %s1811_s14, 3 }
   0x5   : > { %s2354_s15 = smov (%p34_p1, %s32_s15), 0  ;;  %p170_p3 = pnand %p1684_p0, %p169_p2 }
   0x6   : > { %v236_v0 = vld [vmem:[%s2348_s1] sm:$0xff] (!%p170_p3)  ;;  %v237_v2 = vld [vmem:[%s2348_s1 + $0x8] sm:$0xff] (!%p170_p3)  ;;  %p203_p4 = scmp.lt.s32.totalorder (!%p170_p3), %s1803_s12, 1  ;;  %v1813_v8 = vmov (!%p170_p3), 0   ;;  %v238_v14 = vld [vmem:[%s2348_s1 + $0x10] sm:$0xff] (!%p170_p3)  ;;  %vm532_vm0 = vcmask (!%p170_p3), 261120  }
   0x7   : > { %173 = sbr.rel (%p170_p3) target bundleno = 383 (0x17f), region = 32  ;;  %v244_v1 = vld [vmem:[%s2348_s1 + $0x40] sm:$0xff] (!%p170_p3)  ;;  %v245_v4 = vld [vmem:[%s2348_s1 + $0x48] sm:$0xff] (!%p170_p3)  ;;  %577 = vmatprep.mubr.bf16.mxu0 (!%p170_p3), %v1813_v8  ;;  %650 = vmatprep.mubr.bf16.mxu1 (!%p170_p3), %v1813_v8  ;;  %v246_v16 = vld [vmem:[%s2348_s1 + $0x50] sm:$0xff] (!%p170_p3) }
   0x8   : > { %v1693_v3 = vcombine.high (!%p170_p3), %v236_v0, %v244_v1  ;;  %v1692_v5 = vcombine.low (!%p170_p3), %v236_v0, %v244_v1  ;;  %v252_v6 = vld [vmem:[%s2348_s1 + $0x80] sm:$0xff] (!%p170_p3)  ;;  %v1695_v9 = vcombine.high (!%p170_p3), %v237_v2, %v245_v4  ;;  %v1694_v10 = vcombine.low (!%p170_p3), %v237_v2, %v245_v4  ;;  %v253_v12 = vld [vmem:[%s2348_s1 + $0x88] sm:$0xff] (!%p170_p3)  ;;  %v239_v17 = vld [vmem:[%s2348_s1 + $0x18] sm:$0xff] (!%p170_p3) }
   0x9   : > { %v260_v7 = vld [vmem:[%s2348_s1 + $0xc0] sm:$0xff] (!%p170_p3)  ;;  %v261_v13 = vld [vmem:[%s2348_s1 + $0xc8] sm:$0xff] (!%p170_p3)  ;;  %v247_v18 = vld [vmem:[%s2348_s1 + $0x58] sm:$0xff] (!%p170_p3)  ;;  %v1697_v21 = vcombine.high (!%p170_p3), %v238_v14, %v246_v16  ;;  %v1696_v27 = vcombine.low (!%p170_p3), %v238_v14, %v246_v16 }
   0xa   : > { %v1709_v11 = vcombine.high (!%p170_p3), %v252_v6, %v260_v7  ;;  %545 = vmatprep.subr.bf16.mxu0 (!%p170_p3), %v1693_v3  ;;  %v1711_v15 = vcombine.high (!%p170_p3), %v253_v12, %v261_v13  ;;  %618 = vmatprep.subr.bf16.mxu1 (!%p170_p3), %v1695_v9  ;;  %v1708_v19 = vcombine.low (!%p170_p3), %v252_v6, %v260_v7  ;;  %v254_v22 = vld [vmem:[%s2348_s1 + $0x90] sm:$0xff] (!%p170_p3)  ;;  %v255_v25 = vld [vmem:[%s2348_s1 + $0x98] sm:$0xff] (!%p170_p3)  ;;  %v240_v31 = vld [vmem:[%s2348_s1 + $0x20] sm:$0xff] (!%p170_p3) }
   0xb   : > { %546 = vmatpush1.bf16.msra.mxu0 (!%p170_p3), %v1692_v5  ;;  %619 = vmatpush1.bf16.msra.mxu1 (!%p170_p3), %v1694_v10  ;;  %v1710_v20 = vcombine.low (!%p170_p3), %v253_v12, %v261_v13  ;;  %v262_v23 = vld [vmem:[%s2348_s1 + $0xd0] sm:$0xff] (!%p170_p3)  ;;  %v1699_v24 = vcombine.high (!%p170_p3), %v239_v17, %v247_v18  ;;  %v263_v28 = vld [vmem:[%s2348_s1 + $0xd8] sm:$0xff] (!%p170_p3)  ;;  %v1698_v29 = vcombine.low (!%p170_p3), %v239_v17, %v247_v18  ;;  %v248_v32 = vld [vmem:[%s2348_s1 + $0x60] sm:$0xff] (!%p170_p3)  ;;  %v272_v5 = vlaneseq (!%p170_p3) }
   0xc   : > { %547 = vmatprep.subr.bf16.mxu0 (!%p170_p3), %v1709_v11  ;;  %620 = vmatprep.subr.bf16.mxu1 (!%p170_p3), %v1711_v15  ;;  %v1713_v30 = vcombine.high (!%p170_p3), %v254_v22, %v262_v23  ;;  %v1715_v33 = vcombine.high (!%p170_p3), %v255_v25, %v263_v28  ;;  %v241_v34 = vld [vmem:[%s2348_s1 + $0x28] sm:$0xff] (!%p170_p3)  ;;  %v1712_v36 = vcombine.low (!%p170_p3), %v254_v22, %v262_v23  ;;  %v256_v43 = vld [vmem:[%s2348_s1 + $0xa0] sm:$0xff] (!%p170_p3)  ;;  %v242_v50 = vld [vmem:[%s2348_s1 + $0x30] sm:$0xff] (!%p170_p3) }
   0xd   : > { %v249_v35 = vld [vmem:[%s2348_s1 + $0x68] sm:$0xff] (!%p170_p3)  ;;  %v1714_v37 = vcombine.low (!%p170_p3), %v255_v25, %v263_v28  ;;  %v1701_v38 = vcombine.high (!%p170_p3), %v240_v31, %v248_v32  ;;  %v264_v44 = vld [vmem:[%s2348_s1 + $0xe0] sm:$0xff] (!%p170_p3)  ;;  %v1700_v45 = vcombine.low (!%p170_p3), %v240_v31, %v248_v32  ;;  %v250_v51 = vld [vmem:[%s2348_s1 + $0x70] sm:$0xff] (!%p170_p3)  ;;  %v2066_v6 = vshrl.u32 (!%p170_p3), %v272_v5, 7 }
   0xe   : > { %s2356_s12 = smov (!%p203_p4, %s1803_s12), 1  ;;  %v1703_v39 = vcombine.high %v241_v34, %v249_v35  ;;  %v257_v46 = vld [vmem:[%s2348_s1 + $0xa8] sm:$0xff]  ;;  %v1702_v48 = vcombine.low %v241_v34, %v249_v35  ;;  %v1717_v49 = vcombine.high %v256_v43, %v264_v44  ;;  %v243_v53 = vld [vmem:[%s2348_s1 + $0x38] sm:$0xff]  ;;  %v1716_v55 = vcombine.low %v256_v43, %v264_v44  ;;  %v258_v59 = vld [vmem:[%s2348_s1 + $0xb0] sm:$0xff] }
   0xf   : > { %s1758_s17 = sshll.u32 %s2356_s12, 5  ;;  %548 = vmatpush1.bf16.msra.mxu0 %v1708_v19  ;;  %621 = vmatpush1.bf16.msra.mxu1 %v1710_v20  ;;  %v265_v47 = vld [vmem:[%s2348_s1 + $0xe8] sm:$0xff]  ;;  %v251_v54 = vld [vmem:[%s2348_s1 + $0x78] sm:$0xff]  ;;  %v1705_v57 = vcombine.high %v242_v50, %v250_v51  ;;  %v266_v60 = vld [vmem:[%s2348_s1 + $0xf0] sm:$0xff]  ;;  %v1704_v61 = vcombine.low %v242_v50, %v250_v51  ;;  %v274_v7 = vsub.s32 0, %v2066_v6  ;;  %v282_v10 = vsub.s32 2, %v2066_v6 }
  0x10   : > { %s1898_s20 = scalar_lea.vmem %s2347_s0, %s1758_s17  ;;  %691 = vmatprep.subr.bf16.mxu0 %v1697_v21  ;;  %764 = vmatprep.subr.bf16.mxu1 %v1699_v24  ;;  %v1719_v52 = vcombine.high %v257_v46, %v265_v47  ;;  %v1718_v56 = vcombine.low %v257_v46, %v265_v47  ;;  %v1707_v58 = vcombine.high %v243_v53, %v251_v54  ;;  %v259_v62 = vld [vmem:[%s2348_s1 + $0xb8] sm:$0xff]  ;;  %v2072_v9 = vld [vmem:[%s2349_s2] sm:$0xff]  ;;  %v286_v11 = vsub.s32 3, %v2066_v6  ;;  %s1687_s19 = sshll.u32 %s2356_s12, 4 }
  0x11   : > { %v1910_v26 = vld [vmem:[%s1898_s20] sm:$0xff]   ;;  %v1934_v40 = vld [vmem:[%s1898_s20 + $0x8] sm:$0xff]   ;;  %v1943_v41 = vld [vmem:[%s1898_s20 + $0x10] sm:$0xff]   ;;  %v1706_v0 = vcombine.low %v243_v53, %v251_v54  ;;  %v1721_v1 = vcombine.high %v258_v59, %v266_v60  ;;  %v1720_v3 = vcombine.low %v258_v59, %v266_v60  ;;  %v2080_v12 = vrot.slane %v2072_v9, %v274_v7  ;;  %s2265_s12 = scalar_lea.vmem %s2350_s3, %s1687_s19 }
  0x12   : > { %1724 = vmatmul.mubr.msk.bf16.vlgmr.msra.gmra.mrb[0].mxu0 %vm532_vm0, %v1910_v26  ;;  %1728 = vmatmul.mubr.msk.bf16.vlgmr.msra.gmra.mrb[0].mxu1 %vm532_vm0, %v1910_v26  ;;  %v1952_v42 = vld [vmem:[%s1898_s20 + $0x18] sm:$0xff]   ;;  %v2085_v13 = vrot.slane %v2072_v9, %v282_v10  ;;  %v2095_v15 = vrot.slane %v2072_v9, %v286_v11 }
  0x13   : > { %692 = vmatpush1.bf16.msra.mxu0 %v1696_v27  ;;  %765 = vmatpush1.bf16.msra.mxu1 %v1698_v29  ;;  %v267_v63 = vld [vmem:[%s2348_s1 + $0xf8] sm:$0xff] }
  0x14   : > { %587 = vmatprep.mubr.bf16.mxu0 %v1813_v8  ;;  %660 = vmatprep.mubr.bf16.mxu1 %v1813_v8  ;;  %v1723_v2 = vcombine.high %v259_v62, %v267_v63  ;;  %v1722_v4 = vcombine.low %v259_v62, %v267_v63 }
  0x15   : > { %693 = vmatprep.subr.bf16.mxu0 %v1713_v30  ;;  %766 = vmatprep.subr.bf16.mxu1 %v1715_v33 }
  0x17   : > { %694 = vmatpush1.bf16.msra.mxu0 %v1712_v36  ;;  %767 = vmatpush1.bf16.msra.mxu1 %v1714_v37 }
  0x18   : > { %837 = vmatprep.subr.bf16.mxu0 %v1701_v38  ;;  %910 = vmatprep.subr.bf16.mxu1 %v1703_v39 }
  0x1a   : > { %1725 = vmatmul.mubr.msk.bf16.gmra.mrb[4].mxu0 %vm532_vm0, %v1934_v40  ;;  %1729 = vmatmul.mubr.msk.bf16.gmra.mrb[4].mxu1 %vm532_vm0, %v1934_v40 }
  0x1b   : > { %597 = vmatprep.mubr.bf16.mxu0 %v1813_v8  ;;  %670 = vmatprep.mubr.bf16.mxu1 %v1813_v8 }
  0x22   : > { %1726 = vmatmul.mubr.msk.bf16.gmra.mrb[8].mxu0 %vm532_vm0, %v1943_v41  ;;  %1730 = vmatmul.mubr.msk.bf16.gmra.mrb[8].mxu1 %vm532_vm0, %v1943_v41 }
  0x23   : > { %607 = vmatprep.mubr.bf16.mxu0 %v1813_v8  ;;  %680 = vmatprep.mubr.bf16.mxu1 %v1813_v8 }
  0x2a   : > { %1727 = vmatmul.mubr.msk.bf16.gmra.mrb[12].mxu0 %vm532_vm0, %v1952_v42  ;;  %1731 = vmatmul.mubr.msk.bf16.gmra.mrb[12].mxu1 %vm532_vm0, %v1952_v42 }
  0x2b   : > { %723 = vmatprep.mubr.bf16.mxu0 %v1813_v8  ;;  %796 = vmatprep.mubr.bf16.mxu1 %v1813_v8 }
  0x32   : > { %1732 = vmatmul.mubr.msk.bf16.vlgmr.msra.gmra.mrb[16].mxu0 %vm532_vm0, %v1910_v26  ;;  %1736 = vmatmul.mubr.msk.bf16.vlgmr.msra.gmra.mrb[16].mxu1 %vm532_vm0, %v1910_v26 }
  0x33   : > { %838 = vmatpush1.bf16.msra.mxu0 %v1700_v45  ;;  %911 = vmatpush1.bf16.msra.mxu1 %v1702_v48 }
  0x34   : > { %733 = vmatprep.mubr.bf16.mxu0 %v1813_v8  ;;  %806 = vmatprep.mubr.bf16.mxu1 %v1813_v8 }
  0x35   : > { %839 = vmatprep.subr.bf16.mxu0 %v1717_v49  ;;  %912 = vmatprep.subr.bf16.mxu1 %v1719_v52 }
  0x37   : > { %840 = vmatpush1.bf16.msra.mxu0 %v1716_v55  ;;  %913 = vmatpush1.bf16.msra.mxu1 %v1718_v56 }
  0x38   : > { %983 = vmatprep.subr.bf16.mxu0 %v1705_v57  ;;  %1056 = vmatprep.subr.bf16.mxu1 %v1707_v58 }
  0x3a   : > { %1733 = vmatmul.mubr.msk.bf16.gmra.mrb[20].mxu0 %vm532_vm0, %v1934_v40  ;;  %1737 = vmatmul.mubr.msk.bf16.gmra.mrb[20].mxu1 %vm532_vm0, %v1934_v40 }
  0x3b   : > { %743 = vmatprep.mubr.bf16.mxu0 %v1813_v8  ;;  %816 = vmatprep.mubr.bf16.mxu1 %v1813_v8 }
  0x42   : > { %1734 = vmatmul.mubr.msk.bf16.gmra.mrb[24].mxu0 %vm532_vm0, %v1943_v41  ;;  %1738 = vmatmul.mubr.msk.bf16.gmra.mrb[24].mxu1 %vm532_vm0, %v1943_v41 }
  0x43   : > { %753 = vmatprep.mubr.bf16.mxu0 %v1813_v8  ;;  %826 = vmatprep.mubr.bf16.mxu1 %v1813_v8 }
  0x4a   : > { %1735 = vmatmul.mubr.msk.bf16.gmra.mrb[28].mxu0 %vm532_vm0, %v1952_v42  ;;  %1739 = vmatmul.mubr.msk.bf16.gmra.mrb[28].mxu1 %vm532_vm0, %v1952_v42 }
  0x4b   : > { %869 = vmatprep.mubr.bf16.mxu0 %v1813_v8  ;;  %942 = vmatprep.mubr.bf16.mxu1 %v1813_v8 }
  0x52   : > { %1740 = vmatmul.mubr.msk.bf16.vlgmr.msra.gmra.mrb[32].mxu0 %vm532_vm0, %v1910_v26  ;;  %1744 = vmatmul.mubr.msk.bf16.vlgmr.msra.gmra.mrb[32].mxu1 %vm532_vm0, %v1910_v26 }
  0x53   : > { %984 = vmatpush1.bf16.msra.mxu0 %v1704_v61  ;;  %1057 = vmatpush1.bf16.msra.mxu1 %v1706_v0 }
  0x54   : > { %879 = vmatprep.mubr.bf16.mxu0 %v1813_v8  ;;  %952 = vmatprep.mubr.bf16.mxu1 %v1813_v8 }
  0x55   : > { %985 = vmatprep.subr.bf16.mxu0 %v1721_v1  ;;  %1058 = vmatprep.subr.bf16.mxu1 %v1723_v2 }
  0x57   : > { %986 = vmatpush1.bf16.msra.mxu0 %v1720_v3  ;;  %1059 = vmatpush1.bf16.msra.mxu1 %v1722_v4 }
  0x5a   : > { %1741 = vmatmul.mubr.msk.bf16.gmra.mrb[36].mxu0 %vm532_vm0, %v1934_v40  ;;  %1745 = vmatmul.mubr.msk.bf16.gmra.mrb[36].mxu1 %vm532_vm0, %v1934_v40 }
  0x5b   : > { %889 = vmatprep.mubr.bf16.mxu0 %v1813_v8  ;;  %962 = vmatprep.mubr.bf16.mxu1 %v1813_v8 }
  0x62   : > { %1742 = vmatmul.mubr.msk.bf16.gmra.mrb[40].mxu0 %vm532_vm0, %v1943_v41  ;;  %1746 = vmatmul.mubr.msk.bf16.gmra.mrb[40].mxu1 %vm532_vm0, %v1943_v41 }
  0x63   : > { %899 = vmatprep.mubr.bf16.mxu0 %v1813_v8  ;;  %972 = vmatprep.mubr.bf16.mxu1 %v1813_v8 }
  0x6a   : > { %1743 = vmatmul.mubr.msk.bf16.gmra.mrb[44].mxu0 %vm532_vm0, %v1952_v42  ;;  %1747 = vmatmul.mubr.msk.bf16.gmra.mrb[44].mxu1 %vm532_vm0, %v1952_v42 }
  0x6b   : > { %1015 = vmatprep.mubr.bf16.mxu0 %v1813_v8  ;;  %1088 = vmatprep.mubr.bf16.mxu1 %v1813_v8 }
  0x72   : > { %1748 = vmatmul.mubr.msk.bf16.vlgmr.msra.gmra.mrb[48].mxu0 %vm532_vm0, %v1910_v26  ;;  %1752 = vmatmul.mubr.msk.bf16.vlgmr.msra.gmra.mrb[48].mxu1 %vm532_vm0, %v1910_v26 }
  0x73   : > { %1025 = vmatprep.mubr.bf16.mxu0 %v1813_v8  ;;  %1098 = vmatprep.mubr.bf16.mxu1 %v1813_v8 }
  0x7a   : > { %1749 = vmatmul.mubr.msk.bf16.gmra.mrb[52].mxu0 %vm532_vm0, %v1934_v40  ;;  %1753 = vmatmul.mubr.msk.bf16.gmra.mrb[52].mxu1 %vm532_vm0, %v1934_v40 }
  0x7b   : > { %1035 = vmatprep.mubr.bf16.mxu0 %v1813_v8  ;;  %1108 = vmatprep.mubr.bf16.mxu1 %v1813_v8 }
  0x82   : > { %1750 = vmatmul.mubr.msk.bf16.gmra.mrb[56].mxu0 %vm532_vm0, %v1943_v41  ;;  %1754 = vmatmul.mubr.msk.bf16.gmra.mrb[56].mxu1 %vm532_vm0, %v1943_v41 }
  0x83   : > { %1045 = vmatprep.mubr.bf16.mxu0 %v1813_v8  ;;  %1118 = vmatprep.mubr.bf16.mxu1 %v1813_v8  ;;  %v278_v8 = vsub.s32 1, %v2066_v6 }
  0x85   : > { %v2090_v14 = vrot.slane %v2072_v9, %v278_v8 }
  0x8a   : > { %1751 = vmatmul.mubr.msk.bf16.gmra.mrb[60].mxu0 %vm532_vm0, %v1952_v42  ;;  %1755 = vmatmul.mubr.msk.bf16.gmra.mrb[60].mxu1 %vm532_vm0, %v1952_v42 }
  0xe5   : > { %v579_v16 = vpop.f32.mrb[0].mxu0  ;;  %v652_v18 = vpop.f32.mrb[0].mxu1 }
  0xe6   : > { %v580_v17 = vadd.f32 %v579_v16, %v2080_v12  ;;  %v581_v19 = vpop.f32.mrb[1].mxu0  ;;  %v653_v20 = vadd.f32 %v652_v18, %v2085_v13  ;;  %v654_v22 = vpop.f32.mrb[1].mxu1 }
  0xe7   : > { %v582_v21 = vadd.f32 %v581_v19, %v2090_v14  ;;  %v583_v23 = vpop.f32.mrb[2].mxu0  ;;  %v655_v24 = vadd.f32 %v654_v22, %v2095_v15  ;;  %v656_v26 = vpop.f32.mrb[2].mxu1 }
  0xe8   : > { %v584_v25 = vadd.f32 %v583_v23, %v2080_v12  ;;  %v585_v27 = vpop.f32.mrb[3].mxu0  ;;  %v657_v28 = vadd.f32 %v656_v26, %v2085_v13  ;;  %v658_v30 = vpop.f32.mrb[3].mxu1  ;;  %v1129_v31 = vmax.f32 %v580_v17, 0.0  ;;  %v1131_v34 = vmax.f32 %v653_v20, 0.0 }
  0xe9   : > { %v586_v29 = vadd.f32 %v585_v27, %v2090_v14  ;;  %v659_v33 = vadd.f32 %v658_v30, %v2095_v15  ;;  %v1130_v35 = vmax.f32 %v582_v21, 0.0  ;;  %v1132_v38 = vmax.f32 %v655_v24, 0.0 }
  0xea   : > { %v1145_v32 = vmax.f32 %v584_v25, 0.0  ;;  %v1147_v36 = vmax.f32 %v657_v28, 0.0  ;;  %v290_v26 = vsub.s32 4, %v2066_v6 }
  0xeb   : > { %v1146_v37 = vmax.f32 %v586_v29, 0.0  ;;  %v1148_v40 = vmax.f32 %v659_v33, 0.0 }
  0xec   : > { %v1259_v39 = vadd.f32 %v1145_v32, %v1129_v31  ;;  %v1285_v41 = vadd.f32 %v1147_v36, %v1131_v34  ;;  %v298_v31 = vsub.s32 6, %v2066_v6  ;;  %v294_v32 = vsub.s32 5, %v2066_v6 }
  0xed   : > { %v1272_v42 = vadd.f32 %v1146_v37, %v1130_v35  ;;  %v589_v43 = vpop.f32.mrb[4].mxu0  ;;  %v1298_v44 = vadd.f32 %v1148_v40, %v1132_v38  ;;  %v662_v46 = vpop.f32.mrb[4].mxu1 }
  0xee   : > { %v590_v45 = vadd.f32 %v589_v43, %v2080_v12  ;;  %v591_v47 = vpop.f32.mrb[5].mxu0  ;;  %v663_v48 = vadd.f32 %v662_v46, %v2085_v13  ;;  %v664_v50 = vpop.f32.mrb[5].mxu1 }
  0xef   : > { %v592_v49 = vadd.f32 %v591_v47, %v2090_v14  ;;  %v593_v51 = vpop.f32.mrb[6].mxu0  ;;  %v665_v53 = vadd.f32 %v664_v50, %v2095_v15  ;;  %v666_v55 = vpop.f32.mrb[6].mxu1 }
  0xf0   : > { %v1161_v52 = vmax.f32 %v590_v45, 0.0  ;;  %v594_v54 = vadd.f32 %v593_v51, %v2080_v12  ;;  %v595_v56 = vpop.f32.mrb[7].mxu0  ;;  %v1163_v57 = vmax.f32 %v663_v48, 0.0  ;;  %v667_v59 = vadd.f32 %v666_v55, %v2085_v13  ;;  %v668_v61 = vpop.f32.mrb[7].mxu1 }
  0xf1   : > { %v1162_v58 = vmax.f32 %v592_v49, 0.0  ;;  %v596_v60 = vadd.f32 %v595_v56, %v2090_v14  ;;  %v1164_v63 = vmax.f32 %v665_v53, 0.0  ;;  %v669_v1 = vadd.f32 %v668_v61, %v2095_v15 }
  0xf2   : > { %v1260_v62 = vadd.f32 %v1259_v39, %v1161_v52  ;;  %v1177_v0 = vmax.f32 %v594_v54, 0.0  ;;  %v1286_v2 = vadd.f32 %v1285_v41, %v1163_v57  ;;  %v1179_v4 = vmax.f32 %v667_v59, 0.0 }
  0xf3   : > { %v1273_v3 = vadd.f32 %v1272_v42, %v1162_v58  ;;  %v1178_v5 = vmax.f32 %v596_v60, 0.0  ;;  %v1299_v16 = vadd.f32 %v1298_v44, %v1164_v63  ;;  %v1180_v18 = vmax.f32 %v669_v1, 0.0 }
  0xf4   : > { %v1261_v17 = vadd.f32 %v1260_v62, %v1177_v0  ;;  %v1287_v19 = vadd.f32 %v1286_v2, %v1179_v4  ;;  %v1814_v54 = vmov 1966171168   ;;  %v2128_v63 = vrot.slane %v2072_v9, %v290_v26 }
  0xf5   : > { %v1274_v20 = vadd.f32 %v1273_v3, %v1178_v5  ;;  %v599_v21 = vpop.f32.mrb[8].mxu0  ;;  %v1300_v22 = vadd.f32 %v1299_v16, %v1180_v18  ;;  %v672_v24 = vpop.f32.mrb[8].mxu1  ;;  %v1488_v55 = vunpack.c.l.s4 %v1814_v54  ;;  %v302_v0 = vsub.s32 7, %v2066_v6 }
  0xf6   : > { %v600_v23 = vadd.f32 %v599_v21, %v2080_v12  ;;  %v601_v25 = vpop.f32.mrb[9].mxu0  ;;  %v673_v27 = vadd.f32 %v672_v24, %v2085_v13  ;;  %v674_v29 = vpop.f32.mrb[9].mxu1  ;;  %v2136_v5 = vrot.slane %v2072_v9, %v298_v31  ;;  %v2141_v16 = vrot.slane %v2072_v9, %v294_v32 }
  0xf7   : > { %v602_v28 = vadd.f32 %v601_v25, %v2090_v14  ;;  %v603_v30 = vpop.f32.mrb[10].mxu0  ;;  %v675_v34 = vadd.f32 %v674_v29, %v2095_v15  ;;  %v676_v36 = vpop.f32.mrb[10].mxu1 }
  0xf8   : > { %v1193_v33 = vmax.f32 %v600_v23, 0.0  ;;  %v604_v35 = vadd.f32 %v603_v30, %v2080_v12  ;;  %v605_v37 = vpop.f32.mrb[11].mxu0  ;;  %v1195_v38 = vmax.f32 %v673_v27, 0.0  ;;  %v677_v40 = vadd.f32 %v676_v36, %v2085_v13  ;;  %v678_v42 = vpop.f32.mrb[11].mxu1 }
  0xf9   : > { %v1194_v39 = vmax.f32 %v602_v28, 0.0  ;;  %v606_v41 = vadd.f32 %v605_v37, %v2090_v14  ;;  %v1196_v44 = vmax.f32 %v675_v34, 0.0  ;;  %v679_v46 = vadd.f32 %v678_v42, %v2095_v15 }
  0xfa   : > { %v1262_v43 = vadd.f32 %v1261_v17, %v1193_v33  ;;  %v1209_v45 = vmax.f32 %v604_v35, 0.0  ;;  %v1288_v47 = vadd.f32 %v1287_v19, %v1195_v38  ;;  %v1211_v49 = vmax.f32 %v677_v40, 0.0 }
  0xfb   : > { %v1275_v48 = vadd.f32 %v1274_v20, %v1194_v39  ;;  %v1210_v50 = vmax.f32 %v606_v41, 0.0  ;;  %v1301_v51 = vadd.f32 %v1300_v22, %v1196_v44  ;;  %v1212_v53 = vmax.f32 %v679_v46, 0.0 }
  0xfc   : > { %v1263_v52 = vadd.f32 %v1262_v43, %v1209_v45  ;;  %v1289_v56 = vadd.f32 %v1288_v47, %v1211_v49  ;;  %v1489_v22 = vunpack.c.0.s8 %v1488_v55  ;;  %v2151_v41 = vrot.slane %v2072_v9, %v302_v0 }
  0xfd   : > { %v1276_v57 = vadd.f32 %v1275_v48, %v1210_v50  ;;  %v609_v58 = vpop.f32.mrb[12].mxu0  ;;  %v1302_v59 = vadd.f32 %v1301_v51, %v1212_v53  ;;  %v682_v61 = vpop.f32.mrb[12].mxu1 }
  0xfe   : > { %v610_v60 = vadd.f32 %v609_v58, %v2080_v12  ;;  %v611_v62 = vpop.f32.mrb[13].mxu0  ;;  %v683_v1 = vadd.f32 %v682_v61, %v2085_v13  ;;  %v684_v3 = vpop.f32.mrb[13].mxu1  ;;  %v2154_v44 = vsub.s32 %v1489_v22, %v2066_v6 }
  0xff   : > { %v612_v2 = vadd.f32 %v611_v62, %v2090_v14  ;;  %v613_v4 = vpop.f32.mrb[14].mxu0  ;;  %v685_v18 = vadd.f32 %v684_v3, %v2095_v15  ;;  %v686_v20 = vpop.f32.mrb[14].mxu1 }
 0x100   : > { %v1225_v17 = vmax.f32 %v610_v60, 0.0  ;;  %v614_v19 = vadd.f32 %v613_v4, %v2080_v12  ;;  %v615_v21 = vpop.f32.mrb[15].mxu0  ;;  %v1227_v23 = vmax.f32 %v683_v1, 0.0  ;;  %v687_v25 = vadd.f32 %v686_v20, %v2085_v13  ;;  %v688_v28 = vpop.f32.mrb[15].mxu1 }
 0x101   : > { %v1226_v24 = vmax.f32 %v612_v2, 0.0  ;;  %v616_v27 = vadd.f32 %v615_v21, %v2090_v14  ;;  %v1228_v30 = vmax.f32 %v685_v18, 0.0  ;;  %v689_v34 = vadd.f32 %v688_v28, %v2095_v15 }
 0x102   : > { %v1264_v29 = vadd.f32 %v1263_v52, %v1225_v17  ;;  %v1241_v33 = vmax.f32 %v614_v19, 0.0  ;;  %v1290_v35 = vadd.f32 %v1289_v56, %v1227_v23  ;;  %v1243_v37 = vmax.f32 %v687_v25, 0.0 }
 0x103   : > { %v1277_v36 = vadd.f32 %v1276_v57, %v1226_v24  ;;  %v1242_v38 = vmax.f32 %v616_v27, 0.0  ;;  %v1303_v12 = vadd.f32 %v1302_v59, %v1228_v30  ;;  %v1244_v40 = vmax.f32 %v689_v34, 0.0 }
 0x104   : > { %v1265_v39 = vadd.f32 %v1264_v29, %v1241_v33  ;;  %v1291_v13 = vadd.f32 %v1290_v35, %v1243_v37 }
 0x105   : > { %v1278_v14 = vadd.f32 %v1277_v36, %v1242_v38  ;;  %v725_v42 = vpop.f32.mrb[16].mxu0  ;;  %v1304_v15 = vadd.f32 %v1303_v12, %v1244_v40  ;;  %v798_v46 = vpop.f32.mrb[16].mxu1 }
 0x106   : > { %v1266_v43 = vrot.slane %v1265_v39, 4  ;;  %v726_v45 = vadd.f32 %v725_v42, %v2128_v63  ;;  %v727_v47 = vpop.f32.mrb[17].mxu0  ;;  %v1292_v48 = vrot.slane %v1291_v13, 4  ;;  %v799_v50 = vadd.f32 %v798_v46, %v2136_v5  ;;  %v800_v9 = vpop.f32.mrb[17].mxu1 }
 0x107   : > { %v1279_v49 = vrot.slane %v1278_v14, 4  ;;  %v728_v51 = vadd.f32 %v727_v47, %v2141_v16  ;;  %v729_v52 = vpop.f32.mrb[18].mxu0  ;;  %v1305_v54 = vrot.slane %v1304_v15, 4  ;;  %v801_v56 = vadd.f32 %v800_v9, %v2151_v41  ;;  %v802_v57 = vpop.f32.mrb[18].mxu1 }
 0x108   : > { %v1267_v53 = vadd.f32 %v1266_v43, %v1265_v39  ;;  %v1133_v55 = vmax.f32 %v726_v45, 0.0  ;;  %v731_v58 = vpop.f32.mrb[19].mxu0  ;;  %v1293_v59 = vadd.f32 %v1292_v48, %v1291_v13  ;;  %v1135_v61 = vmax.f32 %v799_v50, 0.0  ;;  %v804_v1 = vpop.f32.mrb[19].mxu1 }
 0x109   : > { %v1280_v60 = vadd.f32 %v1279_v49, %v1278_v14  ;;  %v1134_v62 = vmax.f32 %v728_v51, 0.0  ;;  %v1306_v3 = vadd.f32 %v1305_v54, %v1304_v15  ;;  %v1136_v4 = vmax.f32 %v801_v56, 0.0 }
 0x10a   : > { %v1268_v2 = vrot.slane %v1267_v53, 2  ;;  %v730_v17 = vadd.f32 %v729_v52, %v2128_v63  ;;  %v1294_v18 = vrot.slane %v1293_v59, 2  ;;  %v803_v20 = vadd.f32 %v802_v57, %v2136_v5 }
 0x10b   : > { %v1281_v19 = vrot.slane %v1280_v60, 2  ;;  %v732_v21 = vadd.f32 %v731_v58, %v2141_v16  ;;  %v1307_v23 = vrot.slane %v1306_v3, 2  ;;  %v805_v25 = vadd.f32 %v804_v1, %v2151_v41 }
 0x10c   : > { %v1269_v22 = vadd.f32 %v1268_v2, %v1267_v53  ;;  %v1149_v24 = vmax.f32 %v730_v17, 0.0  ;;  %v1295_v27 = vadd.f32 %v1294_v18, %v1293_v59  ;;  %v1151_v29 = vmax.f32 %v803_v20, 0.0 }
 0x10d   : > { %v1282_v28 = vadd.f32 %v1281_v19, %v1280_v60  ;;  %v1150_v30 = vmax.f32 %v732_v21, 0.0  ;;  %v735_v33 = vpop.f32.mrb[20].mxu0  ;;  %v1308_v35 = vadd.f32 %v1307_v23, %v1306_v3  ;;  %v1152_v37 = vmax.f32 %v805_v25, 0.0  ;;  %v808_v38 = vpop.f32.mrb[20].mxu1 }
 0x10e   : > { %v1270_v34 = vrot.slane %v1269_v22, 1  ;;  %v1311_v36 = vadd.f32 %v1149_v24, %v1133_v55  ;;  %v737_v12 = vpop.f32.mrb[21].mxu0  ;;  %v1296_v39 = vrot.slane %v1295_v27, 1  ;;  %v1337_v13 = vadd.f32 %v1151_v29, %v1135_v61  ;;  %v810_v42 = vpop.f32.mrb[21].mxu1 }
 0x10f   : > { %v1283_v40 = vrot.slane %v1282_v28, 1  ;;  %v1324_v14 = vadd.f32 %v1150_v30, %v1134_v62  ;;  %v739_v43 = vpop.f32.mrb[22].mxu0  ;;  %v1309_v45 = vrot.slane %v1308_v35, 1  ;;  %v1350_v46 = vadd.f32 %v1152_v37, %v1136_v4  ;;  %v812_v48 = vpop.f32.mrb[22].mxu1 }
 0x110   : > { %v1271_v15 = vadd.f32 %v1270_v34, %v1269_v22  ;;  %v736_v47 = vadd.f32 %v735_v33, %v2128_v63  ;;  %v741_v49 = vpop.f32.mrb[23].mxu0  ;;  %v1297_v50 = vadd.f32 %v1296_v39, %v1295_v27  ;;  %v809_v9 = vadd.f32 %v808_v38, %v2136_v5  ;;  %v814_v53 = vpop.f32.mrb[23].mxu1 }
 0x111   : > { %v1284_v51 = vadd.f32 %v1283_v40, %v1282_v28  ;;  %v738_v52 = vadd.f32 %v737_v12, %v2141_v16  ;;  %v1310_v54 = vadd.f32 %v1309_v45, %v1308_v35  ;;  %v811_v56 = vadd.f32 %v810_v42, %v2151_v41 }
 0x112   : > { %v1165_v55 = vmax.f32 %v736_v47, 0.0  ;;  %v740_v57 = vadd.f32 %v739_v43, %v2128_v63  ;;  %v1167_v59 = vmax.f32 %v809_v9, 0.0  ;;  %v813_v61 = vadd.f32 %v812_v48, %v2136_v5  ;;  %v2188_v48 = vld [vmem:[%s2349_s2 + $0x8] sm:$0xff] }
 0x113   : > { %v1483_v58 = vcombine.low %v1271_v15, %v1284_v51  ;;  %v1166_v60 = vmax.f32 %v738_v52, 0.0  ;;  %v1484_v62 = vcombine.low %v1297_v50, %v1310_v54  ;;  %v1168_v2 = vmax.f32 %v811_v56, 0.0 }
 0x114   : > { %v1312_v1 = vadd.f32 %v1311_v36, %v1165_v55  ;;  %v1181_v3 = vmax.f32 %v740_v57, 0.0  ;;  %v1338_v17 = vadd.f32 %v1337_v13, %v1167_v59  ;;  %v1183_v19 = vmax.f32 %v813_v61, 0.0 }
 0x115   : > { %v2171_v4 = vrot.slane %v1483_v58, %v2154_v44  ;;  %v1325_v18 = vadd.f32 %v1324_v14, %v1166_v60  ;;  %v745_v20 = vpop.f32.mrb[24].mxu0  ;;  %v2174_v21 = vrot.slane %v1484_v62, %v2154_v44  ;;  %v1351_v22 = vadd.f32 %v1350_v46, %v1168_v2  ;;  %v818_v25 = vpop.f32.mrb[24].mxu1 }
 0x116   : > { %v1313_v23 = vadd.f32 %v1312_v1, %v1181_v3  ;;  %v742_v24 = vadd.f32 %v741_v49, %v2141_v16  ;;  %v747_v27 = vpop.f32.mrb[25].mxu0  ;;  %v1339_v28 = vadd.f32 %v1338_v17, %v1183_v19  ;;  %v815_v29 = vadd.f32 %v814_v53, %v2151_v41  ;;  %v820_v34 = vpop.f32.mrb[25].mxu1 }
 0x117   : > { %v746_v30 = vadd.f32 %v745_v20, %v2128_v63  ;;  %v819_v33 = vadd.f32 %v818_v25, %v2136_v5  ;;  %v749_v35 = vpop.f32.mrb[26].mxu0  ;;  %v1515_v36 = vcombine.low %v2171_v4, %v2174_v21  ;;  %v748_v38 = vadd.f32 %v747_v27, %v2141_v16  ;;  %v822_v39 = vpop.f32.mrb[26].mxu1 }
 0x118   : > { %v1182_v37 = vmax.f32 %v742_v24, 0.0  ;;  %v821_v12 = vadd.f32 %v820_v34, %v2151_v41  ;;  %v751_v40 = vpop.f32.mrb[27].mxu0  ;;  %v1184_v13 = vmax.f32 %v815_v29, 0.0  ;;  %v750_v43 = vadd.f32 %v749_v35, %v2128_v63  ;;  %v824_v15 = vpop.f32.mrb[27].mxu1 }
 0x119   : > { %v1197_v14 = vmax.f32 %v746_v30, 0.0  ;;  %v1199_v42 = vmax.f32 %v819_v33, 0.0  ;;  %v1198_v46 = vmax.f32 %v748_v38, 0.0  ;;  %v823_v53 = vadd.f32 %v822_v39, %v2136_v5 }
 0x11a   : > { %v1326_v45 = vadd.f32 %v1325_v18, %v1182_v37  ;;  %v1200_v47 = vmax.f32 %v821_v12, 0.0  ;;  %v1352_v49 = vadd.f32 %v1351_v22, %v1184_v13  ;;  %v1213_v9 = vmax.f32 %v750_v43, 0.0 }
 0x11b   : > { %v1314_v50 = vadd.f32 %v1313_v23, %v1197_v14  ;;  %v1340_v51 = vadd.f32 %v1339_v28, %v1199_v42  ;;  %v752_v54 = vadd.f32 %v751_v40, %v2141_v16  ;;  %v825_v55 = vadd.f32 %v824_v15, %v2151_v41 }
 0x11c   : > { %v1327_v52 = vadd.f32 %v1326_v45, %v1198_v46  ;;  %v1353_v56 = vadd.f32 %v1352_v49, %v1200_v47  ;;  %v2196_v59 = vrot.slane %v2188_v48, %v274_v7  ;;  %v1215_v60 = vmax.f32 %v823_v53, 0.0 }
 0x11d   : > { %v1315_v57 = vadd.f32 %v1314_v50, %v1213_v9  ;;  %v755_v58 = vpop.f32.mrb[28].mxu0  ;;  %v1214_v61 = vmax.f32 %v752_v54, 0.0  ;;  %v1216_v62 = vmax.f32 %v825_v55, 0.0  ;;  %v828_v2 = vpop.f32.mrb[28].mxu1  ;;  %v2204_v22 = vrot.slane %v2188_v48, %v282_v10 }
 0x11e   : > { %v756_v1 = vadd.f32 %v755_v58, %v2128_v63  ;;  %v757_v3 = vpop.f32.mrb[29].mxu0  ;;  %v829_v17 = vadd.f32 %v828_v2, %v2136_v5  ;;  %v830_v19 = vpop.f32.mrb[29].mxu1  ;;  %v2209_v7 = vrot.slane %v2188_v48, %v278_v8  ;;  %v1341_v23 = vadd.f32 %v1340_v51, %v1215_v60 }
 0x11f   : > { %v758_v18 = vadd.f32 %v757_v3, %v2141_v16  ;;  %v759_v20 = vpop.f32.mrb[30].mxu0  ;;  %v1328_v24 = vadd.f32 %v1327_v52, %v1214_v61  ;;  %v1354_v25 = vadd.f32 %v1353_v56, %v1216_v62  ;;  %v832_v28 = vpop.f32.mrb[30].mxu1  ;;  %v831_v34 = vadd.f32 %v830_v19, %v2151_v41 }
 0x120   : > { %v1229_v27 = vmax.f32 %v756_v1, 0.0  ;;  %v761_v29 = vpop.f32.mrb[31].mxu0  ;;  %v1231_v30 = vmax.f32 %v829_v17, 0.0  ;;  %v760_v35 = vadd.f32 %v759_v20, %v2128_v63  ;;  %v834_v37 = vpop.f32.mrb[31].mxu1  ;;  %v833_v38 = vadd.f32 %v832_v28, %v2136_v5 }
 0x121   : > { %v1230_v33 = vmax.f32 %v758_v18, 0.0  ;;  %v762_v12 = vadd.f32 %v761_v29, %v2141_v16  ;;  %v835_v8 = vadd.f32 %v834_v37, %v2151_v41  ;;  %v1232_v13 = vmax.f32 %v831_v34, 0.0 }
 0x122   : > { %v1316_v10 = vadd.f32 %v1315_v57, %v1229_v27  ;;  %v1342_v39 = vadd.f32 %v1341_v23, %v1231_v30  ;;  %v1245_v14 = vmax.f32 %v760_v35, 0.0  ;;  %v1247_v42 = vmax.f32 %v833_v38, 0.0 }
 0x123   : > { %v1329_v40 = vadd.f32 %v1328_v24, %v1230_v33  ;;  %v1246_v43 = vmax.f32 %v762_v12, 0.0  ;;  %v1248_v15 = vmax.f32 %v835_v8, 0.0  ;;  %v2219_v45 = vrot.slane %v2188_v48, %v286_v11 }
 0x124   : > { %v1355_v63 = vadd.f32 %v1354_v25, %v1232_v13  ;;  %v1317_v46 = vadd.f32 %v1316_v10, %v1245_v14  ;;  %v2224_v5 = vrot.slane %v2188_v48, %v290_v26  ;;  %v2229_v16 = vrot.slane %v2188_v48, %v298_v31 }
 0x125   : > { %v871_v47 = vpop.f32.mrb[32].mxu0  ;;  %v2235_v41 = vrot.slane %v1515_v36, %v2154_v44  ;;  %v1343_v11 = vadd.f32 %v1342_v39, %v1247_v42  ;;  %v1330_v49 = vadd.f32 %v1329_v40, %v1246_v43  ;;  %v944_v51 = vpop.f32.mrb[32].mxu1 }
 0x126   : > { %v872_v50 = vadd.f32 %v871_v47, %v2196_v59  ;;  %v873_v9 = vpop.f32.mrb[33].mxu0  ;;  %v1318_v52 = vrot.slane %v1317_v46, 4  ;;  %v1356_v26 = vadd.f32 %v1355_v63, %v1248_v15  ;;  %v945_v53 = vadd.f32 %v944_v51, %v2204_v22  ;;  %v946_v31 = vpop.f32.mrb[33].mxu1 }
 0x127   : > { %v874_v54 = vadd.f32 %v873_v9, %v2209_v7  ;;  %v875_v55 = vpop.f32.mrb[34].mxu0  ;;  %v1344_v56 = vrot.slane %v1343_v11, 4  ;;  %v1331_v57 = vrot.slane %v1330_v49, 4  ;;  %v947_v4 = vadd.f32 %v946_v31, %v2219_v45  ;;  %v948_v21 = vpop.f32.mrb[34].mxu1 }
 0x128   : > { %v1137_v58 = vmax.f32 %v872_v50, 0.0  ;;  %v877_v36 = vpop.f32.mrb[35].mxu0  ;;  %v1319_v60 = vadd.f32 %v1318_v52, %v1317_v46  ;;  %v1357_v61 = vrot.slane %v1356_v26, 4  ;;  %v1139_v62 = vmax.f32 %v945_v53, 0.0  ;;  %v950_v2 = vpop.f32.mrb[35].mxu1 }
 0x129   : > { %v1138_v1 = vmax.f32 %v874_v54, 0.0  ;;  %v1345_v3 = vadd.f32 %v1344_v56, %v1343_v11  ;;  %v1332_v17 = vadd.f32 %v1331_v57, %v1330_v49  ;;  %v1140_v18 = vmax.f32 %v947_v4, 0.0 }
 0x12a   : > { %v876_v19 = vadd.f32 %v875_v55, %v2196_v59  ;;  %v1320_v20 = vrot.slane %v1319_v60, 2  ;;  %v1358_v23 = vadd.f32 %v1357_v61, %v1356_v26  ;;  %v949_v24 = vadd.f32 %v948_v21, %v2204_v22 }
 0x12b   : > { %v878_v25 = vadd.f32 %v877_v36, %v2209_v7  ;;  %v1346_v27 = vrot.slane %v1345_v3, 2  ;;  %v1333_v28 = vrot.slane %v1332_v17, 2  ;;  %v951_v30 = vadd.f32 %v950_v2, %v2219_v45 }
 0x12c   : > { %v1153_v29 = vmax.f32 %v876_v19, 0.0  ;;  %v1321_v33 = vadd.f32 %v1320_v20, %v1319_v60  ;;  %v1359_v34 = vrot.slane %v1358_v23, 2  ;;  %v1155_v35 = vmax.f32 %v949_v24, 0.0 }
 0x12d   : > { %v1154_v37 = vmax.f32 %v878_v25, 0.0  ;;  %v881_v10 = vpop.f32.mrb[36].mxu0  ;;  %v1347_v38 = vadd.f32 %v1346_v27, %v1345_v3  ;;  %v1334_v12 = vadd.f32 %v1333_v28, %v1332_v17  ;;  %v1156_v39 = vmax.f32 %v951_v30, 0.0  ;;  %v954_v40 = vpop.f32.mrb[36].mxu1 }
 0x12e   : > { %v1363_v8 = vadd.f32 %v1153_v29, %v1137_v58  ;;  %v883_v13 = vpop.f32.mrb[37].mxu0  ;;  %v1322_v14 = vrot.slane %v1321_v33, 1  ;;  %v1360_v42 = vadd.f32 %v1359_v34, %v1358_v23  ;;  %v1389_v43 = vadd.f32 %v1155_v35, %v1139_v62  ;;  %v956_v63 = vpop.f32.mrb[37].mxu1 }
 0x12f   : > { %v1376_v15 = vadd.f32 %v1154_v37, %v1138_v1  ;;  %v885_v46 = vpop.f32.mrb[38].mxu0  ;;  %v1348_v47 = vrot.slane %v1347_v38, 1  ;;  %v1335_v11 = vrot.slane %v1334_v12, 1  ;;  %v1402_v49 = vadd.f32 %v1156_v39, %v1140_v18  ;;  %v958_v51 = vpop.f32.mrb[38].mxu1 }
 0x130   : > { %v882_v50 = vadd.f32 %v881_v10, %v2196_v59  ;;  %v887_v9 = vpop.f32.mrb[39].mxu0  ;;  %v1323_v52 = vadd.f32 %v1322_v14, %v1321_v33  ;;  %v1361_v26 = vrot.slane %v1360_v42, 1  ;;  %v955_v53 = vadd.f32 %v954_v40, %v2204_v22  ;;  %v960_v31 = vpop.f32.mrb[39].mxu1 }
 0x131   : > { %v884_v54 = vadd.f32 %v883_v13, %v2209_v7  ;;  %v1349_v55 = vadd.f32 %v1348_v47, %v1347_v38  ;;  %v1336_v56 = vadd.f32 %v1335_v11, %v1334_v12  ;;  %v957_v58 = vadd.f32 %v956_v63, %v2219_v45 }
 0x132   : > { %v1169_v57 = vmax.f32 %v882_v50, 0.0  ;;  %v1362_v4 = vadd.f32 %v1361_v26, %v1360_v42  ;;  %v1171_v21 = vmax.f32 %v955_v53, 0.0  ;;  %v886_v60 = vadd.f32 %v885_v46, %v2196_v59 }
 0x133   : > { %v1170_v36 = vmax.f32 %v884_v54, 0.0  ;;  %v1485_v61 = vcombine.low %v1323_v52, %v1336_v56  ;;  %v1172_v1 = vmax.f32 %v957_v58, 0.0  ;;  %v959_v2 = vadd.f32 %v958_v51, %v2204_v22 }
 0x134   : > { %v1364_v62 = vadd.f32 %v1363_v8, %v1169_v57  ;;  %v1486_v3 = vcombine.low %v1349_v55, %v1362_v4  ;;  %v1390_v17 = vadd.f32 %v1389_v43, %v1171_v21  ;;  %v1185_v19 = vmax.f32 %v886_v60, 0.0 }
 0x135   : > { %v1377_v18 = vadd.f32 %v1376_v15, %v1170_v36  ;;  %v891_v20 = vpop.f32.mrb[40].mxu0  ;;  %v1507_v23 = vrot.slane %v1485_v61, %v2154_v44  ;;  %v1403_v24 = vadd.f32 %v1402_v49, %v1172_v1  ;;  %v1187_v25 = vmax.f32 %v959_v2, 0.0  ;;  %v964_v28 = vpop.f32.mrb[40].mxu1 }
 0x136   : > { %v888_v27 = vadd.f32 %v887_v9, %v2209_v7  ;;  %v893_v29 = vpop.f32.mrb[41].mxu0  ;;  %v1514_v30 = vrot.slane %v1486_v3, %v2154_v44  ;;  %v1365_v33 = vadd.f32 %v1364_v62, %v1185_v19  ;;  %v961_v34 = vadd.f32 %v960_v31, %v2219_v45  ;;  %v966_v37 = vpop.f32.mrb[41].mxu1 }
 0x137   : > { %v892_v35 = vadd.f32 %v891_v20, %v2196_v59  ;;  %v895_v10 = vpop.f32.mrb[42].mxu0  ;;  %v1391_v38 = vadd.f32 %v1390_v17, %v1187_v25  ;;  %v965_v8 = vadd.f32 %v964_v28, %v2204_v22  ;;  %v894_v39 = vadd.f32 %v893_v29, %v2209_v7  ;;  %v968_v40 = vpop.f32.mrb[42].mxu1 }
 0x138   : > { %v1186_v12 = vmax.f32 %v888_v27, 0.0  ;;  %v897_v13 = vpop.f32.mrb[43].mxu0  ;;  %v1516_v14 = vcombine.low %v1507_v23, %v1514_v30  ;;  %v1188_v42 = vmax.f32 %v961_v34, 0.0  ;;  %v967_v15 = vadd.f32 %v966_v37, %v2219_v45  ;;  %v970_v63 = vpop.f32.mrb[43].mxu1 }
 0x139   : > { %v1201_v43 = vmax.f32 %v892_v35, 0.0  ;;  %v1203_v47 = vmax.f32 %v965_v8, 0.0  ;;  %v1202_v11 = vmax.f32 %v894_v39, 0.0  ;;  %v896_v49 = vadd.f32 %v895_v10, %v2196_v59 }
 0x13a   : > { %v1378_v46 = vadd.f32 %v1377_v18, %v1186_v12  ;;  %v1530_v50 = vrot.slane %v1516_v14, %v2154_v44  ;;  %v1404_v51 = vadd.f32 %v1403_v24, %v1188_v42  ;;  %v1204_v52 = vmax.f32 %v967_v15, 0.0 }
 0x13b   : > { %v1366_v9 = vadd.f32 %v1365_v33, %v1201_v43  ;;  %v1392_v26 = vadd.f32 %v1391_v38, %v1203_v47  ;;  %v1217_v54 = vmax.f32 %v896_v49, 0.0  ;;  %v969_v31 = vadd.f32 %v968_v40, %v2204_v22 }
 0x13c   : > { %v1379_v53 = vadd.f32 %v1378_v46, %v1202_v11  ;;  %v1531_v55 = vcombine.low %v2235_v41, %v1530_v50  ;;  %v1405_v56 = vadd.f32 %v1404_v51, %v1204_v52  ;;  %v898_v57 = vadd.f32 %v897_v13, %v2209_v7 }
 0x13d   : > { %v971_v58 = vadd.f32 %v970_v63, %v2219_v45  ;;  %v901_v4 = vpop.f32.mrb[44].mxu0  ;;  %v1367_v21 = vadd.f32 %v1366_v9, %v1217_v54  ;;  %v1219_v36 = vmax.f32 %v969_v31, 0.0  ;;  %v974_v61 = vpop.f32.mrb[44].mxu1  ;;  %v2275_v1 = vrot.slane %v2188_v48, %v294_v32 }
 0x13e   : > { %v902_v60 = vadd.f32 %v901_v4, %v2196_v59  ;;  %v903_v62 = vpop.f32.mrb[45].mxu0  ;;  %1592 = vst [vmem:[%s2265_s12] sm:$0xff] %v1531_v55  ;;  %v1218_v2 = vmax.f32 %v898_v57, 0.0  ;;  %v975_v3 = vadd.f32 %v974_v61, %v2204_v22  ;;  %v976_v18 = vpop.f32.mrb[45].mxu1  ;;  %v2288_v42 = vrot.slane %v2188_v48, %v302_v0 }
 0x13f   : > { %v1220_v41 = vmax.f32 %v971_v58, 0.0  ;;  %v904_v17 = vadd.f32 %v903_v62, %v2209_v7  ;;  %v905_v19 = vpop.f32.mrb[46].mxu0  ;;  %v1393_v20 = vadd.f32 %v1392_v26, %v1219_v36  ;;  %v977_v24 = vadd.f32 %v976_v18, %v2219_v45  ;;  %v978_v27 = vpop.f32.mrb[46].mxu1 }
 0x140   : > { %v1233_v23 = vmax.f32 %v902_v60, 0.0  ;;  %v906_v25 = vadd.f32 %v905_v19, %v2196_v59  ;;  %v907_v28 = vpop.f32.mrb[47].mxu0  ;;  %v1380_v29 = vadd.f32 %v1379_v53, %v1218_v2  ;;  %v1235_v30 = vmax.f32 %v975_v3, 0.0  ;;  %v980_v34 = vpop.f32.mrb[47].mxu1 }
 0x141   : > { %v1406_v32 = vadd.f32 %v1405_v56, %v1220_v41  ;;  %v1234_v33 = vmax.f32 %v904_v17, 0.0  ;;  %v1236_v37 = vmax.f32 %v977_v24, 0.0  ;;  %v979_v38 = vadd.f32 %v978_v27, %v2204_v22 }
 0x142   : > { %v1368_v35 = vadd.f32 %v1367_v21, %v1233_v23  ;;  %v1249_v10 = vmax.f32 %v906_v25, 0.0  ;;  %v1394_v12 = vadd.f32 %v1393_v20, %v1235_v30  ;;  %v908_v39 = vadd.f32 %v907_v28, %v2209_v7 }
 0x143   : > { %v1381_v8 = vadd.f32 %v1380_v29, %v1234_v33  ;;  %v981_v40 = vadd.f32 %v980_v34, %v2219_v45  ;;  %v1407_v13 = vadd.f32 %v1406_v32, %v1236_v37  ;;  %v1251_v14 = vmax.f32 %v979_v38, 0.0 }
 0x144   : > { %v1369_v59 = vadd.f32 %v1368_v35, %v1249_v10  ;;  %v1250_v43 = vmax.f32 %v908_v39, 0.0 }
 0x145   : > { %v1252_v15 = vmax.f32 %v981_v40, 0.0  ;;  %v1017_v63 = vpop.f32.mrb[48].mxu0  ;;  %v1395_v47 = vadd.f32 %v1394_v12, %v1251_v14  ;;  %v1090_v11 = vpop.f32.mrb[48].mxu1 }
 0x146   : > { %v1370_v46 = vrot.slane %v1369_v59, 4  ;;  %v1018_v22 = vadd.f32 %v1017_v63, %v2224_v5  ;;  %v1019_v49 = vpop.f32.mrb[49].mxu0  ;;  %v1382_v7 = vadd.f32 %v1381_v8, %v1250_v43  ;;  %v1091_v45 = vadd.f32 %v1090_v11, %v2229_v16  ;;  %v1092_v9 = vpop.f32.mrb[49].mxu1 }
 0x147   : > { %v1408_v50 = vadd.f32 %v1407_v13, %v1252_v15  ;;  %v1020_v51 = vadd.f32 %v1019_v49, %v2275_v1  ;;  %v1021_v6 = vpop.f32.mrb[50].mxu0  ;;  %v1396_v0 = vrot.slane %v1395_v47, 4  ;;  %v1093_v26 = vadd.f32 %v1092_v9, %v2288_v42  ;;  %v1094_v53 = vpop.f32.mrb[50].mxu1 }
 0x148   : > { %v1371_v52 = vadd.f32 %v1370_v46, %v1369_v59  ;;  %v1141_v48 = vmax.f32 %v1018_v22, 0.0  ;;  %v1023_v54 = vpop.f32.mrb[51].mxu0  ;;  %v1383_v31 = vrot.slane %v1382_v7, 4  ;;  %v1143_v56 = vmax.f32 %v1091_v45, 0.0  ;;  %v1096_v58 = vpop.f32.mrb[51].mxu1 }
 0x149   : > { %v1409_v55 = vrot.slane %v1408_v50, 4  ;;  %v1142_v57 = vmax.f32 %v1020_v51, 0.0  ;;  %v1397_v21 = vadd.f32 %v1396_v0, %v1395_v47  ;;  %v1144_v36 = vmax.f32 %v1093_v26, 0.0 }
 0x14a   : > { %v1372_v4 = vrot.slane %v1371_v52, 2  ;;  %v1022_v60 = vadd.f32 %v1021_v6, %v2224_v5  ;;  %v1384_v61 = vadd.f32 %v1383_v31, %v1382_v7  ;;  %v1095_v2 = vadd.f32 %v1094_v53, %v2229_v16 }
 0x14b   : > { %v1410_v62 = vadd.f32 %v1409_v55, %v1408_v50  ;;  %v1024_v41 = vadd.f32 %v1023_v54, %v2275_v1  ;;  %v1398_v17 = vrot.slane %v1397_v21, 2  ;;  %v1097_v19 = vadd.f32 %v1096_v58, %v2288_v42 }
 0x14c   : > { %v1373_v3 = vadd.f32 %v1372_v4, %v1371_v52  ;;  %v1157_v18 = vmax.f32 %v1022_v60, 0.0  ;;  %v1385_v20 = vrot.slane %v1384_v61, 2  ;;  %v1159_v24 = vmax.f32 %v1095_v2, 0.0 }
 0x14d   : > { %v1411_v23 = vrot.slane %v1410_v62, 2  ;;  %v1158_v25 = vmax.f32 %v1024_v41, 0.0  ;;  %v1027_v27 = vpop.f32.mrb[52].mxu0  ;;  %v1399_v29 = vadd.f32 %v1398_v17, %v1397_v21  ;;  %v1160_v30 = vmax.f32 %v1097_v19, 0.0  ;;  %v1100_v33 = vpop.f32.mrb[52].mxu1 }
 0x14e   : > { %v1374_v28 = vrot.slane %v1373_v3, 1  ;;  %v1415_v32 = vadd.f32 %v1157_v18, %v1141_v48  ;;  %v1029_v34 = vpop.f32.mrb[53].mxu0  ;;  %v1386_v35 = vadd.f32 %v1385_v20, %v1384_v61  ;;  %v1441_v10 = vadd.f32 %v1159_v24, %v1143_v56  ;;  %v1102_v12 = vpop.f32.mrb[53].mxu1 }
 0x14f   : > { %v1412_v37 = vadd.f32 %v1411_v23, %v1410_v62  ;;  %v1428_v38 = vadd.f32 %v1158_v25, %v1142_v57  ;;  %v1031_v8 = vpop.f32.mrb[54].mxu0  ;;  %v1400_v40 = vrot.slane %v1399_v29, 1  ;;  %v1454_v13 = vadd.f32 %v1160_v30, %v1144_v36  ;;  %v1104_v14 = vpop.f32.mrb[54].mxu1 }
 0x150   : > { %v1375_v39 = vadd.f32 %v1374_v28, %v1373_v3  ;;  %v1028_v59 = vadd.f32 %v1027_v27, %v2224_v5  ;;  %v1033_v43 = vpop.f32.mrb[55].mxu0  ;;  %v1387_v15 = vrot.slane %v1386_v35, 1  ;;  %v1101_v46 = vadd.f32 %v1100_v33, %v2229_v16  ;;  %v1106_v22 = vpop.f32.mrb[55].mxu1 }
 0x151   : > { %v1413_v63 = vrot.slane %v1412_v37, 1  ;;  %v1030_v47 = vadd.f32 %v1029_v34, %v2275_v1  ;;  %v1401_v11 = vadd.f32 %v1400_v40, %v1399_v29  ;;  %v1103_v7 = vadd.f32 %v1102_v12, %v2288_v42 }
 0x152   : > { %v1173_v49 = vmax.f32 %v1028_v59, 0.0  ;;  %v1032_v50 = vadd.f32 %v1031_v8, %v2224_v5  ;;  %v1388_v45 = vadd.f32 %v1387_v15, %v1386_v35  ;;  %v1175_v9 = vmax.f32 %v1101_v46, 0.0 }
 0x153   : > { %v1414_v51 = vadd.f32 %v1413_v63, %v1412_v37  ;;  %v1174_v6 = vmax.f32 %v1030_v47, 0.0  ;;  %v1176_v0 = vmax.f32 %v1103_v7, 0.0  ;;  %v1105_v26 = vadd.f32 %v1104_v14, %v2229_v16 }
 0x154   : > { %v1416_v52 = vadd.f32 %v1415_v32, %v1173_v49  ;;  %v1189_v48 = vmax.f32 %v1032_v50, 0.0  ;;  %v1532_v53 = vcombine.low %v1375_v39, %v1388_v45  ;;  %v1442_v31 = vadd.f32 %v1441_v10, %v1175_v9 }
 0x155   : > { %v1533_v54 = vcombine.low %v1401_v11, %v1414_v51  ;;  %v1429_v55 = vadd.f32 %v1428_v38, %v1174_v6  ;;  %v1037_v56 = vpop.f32.mrb[56].mxu0  ;;  %v1455_v57 = vadd.f32 %v1454_v13, %v1176_v0  ;;  %v1191_v4 = vmax.f32 %v1105_v26, 0.0  ;;  %v1110_v36 = vpop.f32.mrb[56].mxu1 }
 0x156   : > { %v1417_v58 = vadd.f32 %v1416_v52, %v1189_v48  ;;  %v1034_v21 = vadd.f32 %v1033_v43, %v2275_v1  ;;  %v1039_v60 = vpop.f32.mrb[57].mxu0  ;;  %v2306_v61 = vrot.slane %v1532_v53, %v2154_v44  ;;  %v1107_v2 = vadd.f32 %v1106_v22, %v2288_v42  ;;  %v1112_v3 = vpop.f32.mrb[57].mxu1 }
 0x157   : > { %v2309_v62 = vrot.slane %v1533_v54, %v2154_v44  ;;  %v1038_v41 = vadd.f32 %v1037_v56, %v2224_v5  ;;  %v1041_v17 = vpop.f32.mrb[58].mxu0  ;;  %v1443_v18 = vadd.f32 %v1442_v31, %v1191_v4  ;;  %v1111_v20 = vadd.f32 %v1110_v36, %v2229_v16  ;;  %v1114_v24 = vpop.f32.mrb[58].mxu1 }
 0x158   : > { %v1190_v19 = vmax.f32 %v1034_v21, 0.0  ;;  %v1040_v23 = vadd.f32 %v1039_v60, %v2275_v1  ;;  %v1043_v25 = vpop.f32.mrb[59].mxu0  ;;  %v1192_v28 = vmax.f32 %v1107_v2, 0.0  ;;  %v1113_v32 = vadd.f32 %v1112_v3, %v2288_v42  ;;  %v1116_v30 = vpop.f32.mrb[59].mxu1 }
 0x159   : > { %v1564_v27 = vcombine.low %v2306_v61, %v2309_v62  ;;  %v1205_v29 = vmax.f32 %v1038_v41, 0.0  ;;  %v1207_v34 = vmax.f32 %v1111_v20, 0.0  ;;  %v1042_v37 = vadd.f32 %v1041_v17, %v2224_v5 }
 0x15a   : > { %v1430_v33 = vadd.f32 %v1429_v55, %v1190_v19  ;;  %v1206_v35 = vmax.f32 %v1040_v23, 0.0  ;;  %v1456_v10 = vadd.f32 %v1455_v57, %v1192_v28  ;;  %v1208_v12 = vmax.f32 %v1113_v32, 0.0 }
 0x15b   : > { %v1418_v38 = vadd.f32 %v1417_v58, %v1205_v29  ;;  %v1444_v8 = vadd.f32 %v1443_v18, %v1207_v34  ;;  %v1221_v40 = vmax.f32 %v1042_v37, 0.0  ;;  %v1115_v13 = vadd.f32 %v1114_v24, %v2229_v16 }
 0x15c   : > { %v1431_v39 = vadd.f32 %v1430_v33, %v1206_v35  ;;  %v1457_v59 = vadd.f32 %v1456_v10, %v1208_v12  ;;  %v1044_v14 = vadd.f32 %v1043_v25, %v2275_v1  ;;  %v1117_v43 = vadd.f32 %v1116_v30, %v2288_v42 }
 0x15d   : > { %v1047_v15 = vpop.f32.mrb[60].mxu0  ;;  %v1419_v63 = vadd.f32 %v1418_v38, %v1221_v40  ;;  %v1223_v46 = vmax.f32 %v1115_v13, 0.0  ;;  %v1120_v22 = vpop.f32.mrb[60].mxu1 }
 0x15e   : > { %v1048_v47 = vadd.f32 %v1047_v15, %v2224_v5  ;;  %v1049_v11 = vpop.f32.mrb[61].mxu0  ;;  %v1222_v49 = vmax.f32 %v1044_v14, 0.0  ;;  %v1224_v7 = vmax.f32 %v1117_v43, 0.0  ;;  %v1121_v50 = vadd.f32 %v1120_v22, %v2229_v16  ;;  %v1122_v51 = vpop.f32.mrb[61].mxu1 }
 0x15f   : > { %v1050_v45 = vadd.f32 %v1049_v11, %v2275_v1  ;;  %v1051_v9 = vpop.f32.mrb[62].mxu0  ;;  %v1445_v6 = vadd.f32 %v1444_v8, %v1223_v46  ;;  %v1123_v0 = vadd.f32 %v1122_v51, %v2288_v42  ;;  %v1124_v26 = vpop.f32.mrb[62].mxu1 }
 0x160   : > { %v1237_v52 = vmax.f32 %v1048_v47, 0.0  ;;  %v1052_v48 = vadd.f32 %v1051_v9, %v2224_v5  ;;  %v1053_v53 = vpop.f32.mrb[63].mxu0  ;;  %v1432_v54 = vadd.f32 %v1431_v39, %v1222_v49  ;;  %v1458_v31 = vadd.f32 %v1457_v59, %v1224_v7  ;;  %v1126_v57 = vpop.f32.mrb[63].mxu1 }
 0x161   : > { %v1239_v55 = vmax.f32 %v1121_v50, 0.0  ;;  %v1238_v56 = vmax.f32 %v1050_v45, 0.0  ;;  %v1240_v4 = vmax.f32 %v1123_v0, 0.0  ;;  %v1125_v36 = vadd.f32 %v1124_v26, %v2229_v16 }
 0x162   : > { %v1420_v58 = vadd.f32 %v1419_v63, %v1237_v52  ;;  %v1253_v21 = vmax.f32 %v1052_v48, 0.0  ;;  %v1054_v41 = vadd.f32 %v1053_v53, %v2275_v1  ;;  %v1127_v3 = vadd.f32 %v1126_v57, %v2288_v42 }
 0x163   : > { %v1446_v60 = vadd.f32 %v1445_v6, %v1239_v55  ;;  %v1433_v2 = vadd.f32 %v1432_v54, %v1238_v56  ;;  %v1459_v17 = vadd.f32 %v1458_v31, %v1240_v4  ;;  %v1255_v18 = vmax.f32 %v1125_v36, 0.0 }
 0x164   : > { %v1421_v5 = vadd.f32 %v1420_v58, %v1253_v21  ;;  %v1254_v19 = vmax.f32 %v1054_v41, 0.0  ;;  %v1256_v20 = vmax.f32 %v1127_v3, 0.0  ;;  %v1572_v50 = vrot.slane %v1564_v27, %v2154_v44 }
 0x165   : > { %v1447_v24 = vadd.f32 %v1446_v60, %v1255_v18 }
 0x166   : > { %v1422_v23 = vrot.slane %v1421_v5, 4  ;;  %v1434_v25 = vadd.f32 %v1433_v2, %v1254_v19  ;;  %v1460_v28 = vadd.f32 %v1459_v17, %v1256_v20 }
 0x167   : > { %v1448_v32 = vrot.slane %v1447_v24, 4 }
 0x168   : > { %v1423_v29 = vadd.f32 %v1422_v23, %v1421_v5  ;;  %v1435_v30 = vrot.slane %v1434_v25, 4  ;;  %v1461_v33 = vrot.slane %v1460_v28, 4 }
 0x169   : > { %v1449_v34 = vadd.f32 %v1448_v32, %v1447_v24 }
 0x16a   : > { %v1424_v16 = vrot.slane %v1423_v29, 2  ;;  %v1436_v35 = vadd.f32 %v1435_v30, %v1434_v25  ;;  %v1462_v37 = vadd.f32 %v1461_v33, %v1460_v28 }
 0x16b   : > { %v1450_v10 = vrot.slane %v1449_v34, 2 }
 0x16c   : > { %v1425_v1 = vadd.f32 %v1424_v16, %v1423_v29  ;;  %v1437_v42 = vrot.slane %v1436_v35, 2  ;;  %v1463_v38 = vrot.slane %v1462_v37, 2 }
 0x16d   : > { %v1451_v8 = vadd.f32 %v1450_v10, %v1449_v34 }
 0x16e   : > { %v1426_v12 = vrot.slane %v1425_v1, 1  ;;  %v1438_v39 = vadd.f32 %v1437_v42, %v1436_v35  ;;  %v1464_v40 = vadd.f32 %v1463_v38, %v1462_v37 }
 0x16f   : > { %v1452_v13 = vrot.slane %v1451_v8, 1 }
 0x170   : > { %v1427_v59 = vadd.f32 %v1426_v12, %v1425_v1  ;;  %v1439_v14 = vrot.slane %v1438_v39, 1  ;;  %v1465_v43 = vrot.slane %v1464_v40, 1 }
 0x171   : > { %v1453_v15 = vadd.f32 %v1452_v13, %v1451_v8 }
 0x172   : > { %v1440_v63 = vadd.f32 %v1439_v14, %v1438_v39  ;;  %v1466_v46 = vadd.f32 %v1465_v43, %v1464_v40 }
 0x174   : > { %v1534_v47 = vcombine.low %v1427_v59, %v1440_v63  ;;  %v1535_v22 = vcombine.low %v1453_v15, %v1466_v46 }
 0x176   : > { %v1556_v11 = vrot.slane %v1534_v47, %v2154_v44  ;;  %v1563_v49 = vrot.slane %v1535_v22, %v2154_v44 }
 0x178   : > { %v1565_v7 = vcombine.low %v1556_v11, %v1563_v49 }
 0x17a   : > { %v1579_v45 = vrot.slane %v1565_v7, %v2154_v44 }
 0x17c   : > { %v1580_v51 = vcombine.low %v1572_v50, %v1579_v45 }
 0x17e   : > { %1593 = vst [vmem:[%s2265_s12 + $0x8] sm:$0xff] %v1580_v51 }
 0x17f PF: > { %s13_s14 = sadd.s32 1, %s1811_s14   ;;  %s2351_s12 = smov %s1807_s13 }
 0x180   : > { %p10_p5 = scmp.ge.s32.totalorder %s13_s14, 4   ;;  %s2352_s13 = smov %s2354_s15 }
 0x182   :  { %12 = sbr.rel (!%p10_p5) target bundleno = 2 (0x2), region = 70 }

</bundles_post_ra>
